<compile_context>
chip_gen: v5e
topology: v5e:2x2
jax: 0.10.0
libtpu: 0.0.40
codegen_flags: <defaults>
</compile_context>

<pallas_src>
import math

import jax
import jax.numpy as jnp
from jax import lax
from jax.experimental import pallas as pl
from jax.experimental.pallas import tpu as pltpu


# ---------------------------------------------------------------------------
# Pallas kernels
# ---------------------------------------------------------------------------

def _bidir_lstm_kernel(x_ref, wih_ref, whh_ref, b_ref,
                       out_ref, h_ref, c_ref,
                       xp_i_ref, xp_f_ref, xp_g_ref, xp_o_ref):
    """One bidirectional LSTM layer; grid=(2,) over direction (0=fwd, 1=bwd).

    x_ref   : (S, T*B, Dp)  bf16  inputs, split into S feature chunks
                                  (S=1, Dp=E for layer 0; S=2, Dp=H afterwards,
                                   chunk 0 = fwd features, chunk 1 = bwd)
    wih_ref : (S, Dp, 4H)   bf16  input->gate weights for this direction
    whh_ref : (4, H, H)     bf16  per-gate hidden->gate weights
    b_ref   : (1, 4H)       f32   combined bias (b_ih + b_hh)
    out_ref : (T*B, H)      bf16  this direction's half of the stacked output
    h_ref   : (B, H)        f32   final hidden state for this direction
    c_ref   : (B, H)        f32   final cell state for this direction
    xp_*    : (T*B, H)      f32   scratch: hoisted per-gate input projection
    Gate ordering follows PyTorch: [i, f, g, o].
    """
    direction = pl.program_id(0)
    S, TB, Dp = x_ref.shape
    B, H = h_ref.shape
    T = TB // B

    # ---- Hoisted input projection: one large MXU matmul per source chunk ----
    xp = jnp.dot(x_ref[0], wih_ref[0], preferred_element_type=jnp.float32)
    for s in range(1, S):
        xp = xp + jnp.dot(x_ref[s], wih_ref[s],
                          preferred_element_type=jnp.float32)
    xp = xp + b_ref[...]                                     # (T*B, 4H) f32
    # Split per gate ONCE (outside the recurrence) so the time loop never
    # does sub-lane gate slicing.
    xp_i_ref[...] = xp[:, 0 * H:1 * H]
    xp_f_ref[...] = xp[:, 1 * H:2 * H]
    xp_g_ref[...] = xp[:, 2 * H:3 * H]
    xp_o_ref[...] = xp[:, 3 * H:4 * H]

    # ---- Serial recurrence: only h @ W_hh remains inside the loop ----
    def step(t, carry):
        h, c = carry
        t_idx = jnp.where(direction == 0, t, T - 1 - t)
        row = pl.multiple_of(t_idx * B, 8)                   # B is padded to 8k
        hb = h.astype(jnp.bfloat16)
        g_i = xp_i_ref[pl.ds(row, B), :] + jnp.dot(
            hb, whh_ref[0], preferred_element_type=jnp.float32)
        g_f = xp_f_ref[pl.ds(row, B), :] + jnp.dot(
            hb, whh_ref[1], preferred_element_type=jnp.float32)
        g_g = xp_g_ref[pl.ds(row, B), :] + jnp.dot(
            hb, whh_ref[2], preferred_element_type=jnp.float32)
        g_o = xp_o_ref[pl.ds(row, B), :] + jnp.dot(
            hb, whh_ref[3], preferred_element_type=jnp.float32)
        i = jax.nn.sigmoid(g_i)
        f = jax.nn.sigmoid(g_f)
        g = jnp.tanh(g_g)
        o = jax.nn.sigmoid(g_o)
        c_new = f * c + i * g
        h_new = o * jnp.tanh(c_new)
        out_ref[pl.ds(row, B), :] = h_new.astype(out_ref.dtype)
        return (h_new, c_new)

    h0 = jnp.zeros((B, H), jnp.float32)
    c0 = jnp.zeros((B, H), jnp.float32)
    hT, cT = lax.fori_loop(0, T, step, (h0, c0))
    h_ref[...] = hT
    c_ref[...] = cT


def _heads_kernel(h_ref, c_ref, wh_ref, bh_ref, wc_ref, bc_ref,
                  hid_ref, cell_ref):
    """Fused fc_hidden / fc_cell heads.

    h_ref, c_ref : (2, B, H) f32  layer-0 [fwd, bwd] final states
    wh_ref, wc_ref: (2, H, H) f32 transposed Linear weights, split per half
    bh_ref, bc_ref: (1, H)    f32 biases
    Equivalent to concat([fwd, bwd], -1) @ W.T + b without the concat.
    """
    hid_ref[...] = (jnp.dot(h_ref[0], wh_ref[0], preferred_element_type=jnp.float32)
                    + jnp.dot(h_ref[1], wh_ref[1], preferred_element_type=jnp.float32)
                    + bh_ref[...])
    cell_ref[...] = (jnp.dot(c_ref[0], wc_ref[0], preferred_element_type=jnp.float32)
                     + jnp.dot(c_ref[1], wc_ref[1], preferred_element_type=jnp.float32)
                     + bc_ref[...])


# ---------------------------------------------------------------------------
# Wrappers around pallas_call
# ---------------------------------------------------------------------------

_VMEM = pl.BlockSpec(memory_space=pltpu.MemorySpace.VMEM)


def bidir_lstm_layer(x, wih, whh, b, batch):
    """x: (S, T*B, Dp) bf16 -> (out (2,T*B,H) bf16, h (2,B,H) f32, c (2,B,H) f32)."""
    S, TB, Dp = x.shape
    H = whh.shape[-1]
    B = batch
    assert TB % B == 0 and B % 8 == 0

    grid_spec = pltpu.PrefetchScalarGridSpec(
        num_scalar_prefetch=0,
        grid=(2,),                                  # direction: 0=fwd, 1=bwd
        in_specs=[
            pl.BlockSpec((S, TB, Dp), lambda d: (0, 0, 0)),
            pl.BlockSpec((None, S, Dp, 4 * H), lambda d: (d, 0, 0, 0)),
            pl.BlockSpec((None, 4, H, H), lambda d: (d, 0, 0, 0)),
            pl.BlockSpec((None, 1, 4 * H), lambda d: (d, 0, 0)),
        ],
        out_specs=(
            pl.BlockSpec((None, TB, H), lambda d: (d, 0, 0)),
            pl.BlockSpec((None, B, H), lambda d: (d, 0, 0)),
            pl.BlockSpec((None, B, H), lambda d: (d, 0, 0)),
        ),
        scratch_shapes=[pltpu.VMEM((TB, H), jnp.float32)] * 4,
    )
    out_shape = (jax.ShapeDtypeStruct((2, TB, H), jnp.bfloat16),
                 jax.ShapeDtypeStruct((2, B, H), jnp.float32),
                 jax.ShapeDtypeStruct((2, B, H), jnp.float32))
    return pl.pallas_call(
        _bidir_lstm_kernel,
        out_shape=out_shape,
        grid_spec=grid_spec,
        compiler_params=pltpu.CompilerParams(
            # v7x: the two independent directions land on the two TensorCores.
            dimension_semantics=("parallel",),
            vmem_limit_bytes=64 * 1024 * 1024),
    )(x, wih, whh, b)


def fc_heads(h, c, wh, bh, wc, bc):
    """One pallas_call for both Linear heads."""
    B = h.shape[1]
    H = wh.shape[-1]
    return pl.pallas_call(
        _heads_kernel,
        out_shape=(jax.ShapeDtypeStruct((B, H), jnp.float32),
                   jax.ShapeDtypeStruct((B, H), jnp.float32)),
        in_specs=[_VMEM] * 6,
        out_specs=(_VMEM, _VMEM),
    )(h, c, wh, bh, wc, bc)


# ---------------------------------------------------------------------------
# Parameter construction (deterministic, PyTorch-like uniform init)
# ---------------------------------------------------------------------------

def init_encoder_params(key, input_size, embedding_size, hidden_size, num_layers):
    keys = iter(jax.random.split(key, 128))
    H = hidden_size

    def uni(shape, bound):
        return jax.random.uniform(next(keys), shape, jnp.float32, -bound, bound)

    params = {"embedding": jax.random.normal(
        next(keys), (input_size, embedding_size), jnp.float32)}

    bound = 1.0 / math.sqrt(H)
    lstm = []
    for layer in range(num_layers):
        d_in = embedding_size if layer == 0 else 2 * H
        S = 1 if layer == 0 else 2
        Dp = d_in // S
        wih_dirs, whh_dirs, b_dirs = [], [], []
        for _ in range(2):                        # forward, backward
            w_ih = uni((4 * H, d_in), bound)      # PyTorch layout (4H, d_in)
            w_hh = uni((4 * H, H), bound)
            b_ih = uni((4 * H,), bound)
            b_hh = uni((4 * H,), bound)
            # Transposed, split into S source chunks: (S, Dp, 4H).
            wih_dirs.append(w_ih.T.reshape(S, Dp, 4 * H))
            # Per-gate (4, H, H) so the recurrence never slices the lane axis.
            whh_dirs.append(w_hh.T.reshape(H, 4, H).transpose(1, 0, 2))
            b_dirs.append((b_ih + b_hh).reshape(1, 4 * H))
        lstm.append({
            "wih": jnp.stack(wih_dirs).astype(jnp.bfloat16),   # (2, S, Dp, 4H)
            "whh": jnp.stack(whh_dirs).astype(jnp.bfloat16),   # (2, 4, H, H)
            "b": jnp.stack(b_dirs),                            # (2, 1, 4H) f32
        })
    params["lstm"] = lstm

    fcb = 1.0 / math.sqrt(2 * H)
    # Linear(2H, H): y = x @ W.T + b. Store W.T split per (fwd, bwd) half.
    params["fc_hidden_w"] = uni((H, 2 * H), fcb).T.reshape(2, H, H)
    params["fc_hidden_b"] = uni((H,), fcb).reshape(1, H)
    params["fc_cell_w"] = uni((H, 2 * H), fcb).T.reshape(2, H, H)
    params["fc_cell_b"] = uni((H,), fcb).reshape(1, H)
    return params


# ---------------------------------------------------------------------------
# Encoder forward
# ---------------------------------------------------------------------------

def encoder_forward(params, src):
    """src: (T, B) int32 -> (encoder_states, hidden, cell)."""
    T, B = src.shape
    B_pad = ((B + 7) // 8) * 8                 # pad batch to f32 sublane granule
    src_p = jnp.pad(src, ((0, 0), (0, B_pad - B)))

    # Embedding lookup (plain-JAX glue); activations in bf16 for the MXU path.
    emb = jnp.take(params["embedding"], src_p, axis=0)        # (T, Bp, E) f32
    # TODO(synk): nn.Dropout applied in eval mode (identity); training-mode
    # stochastic masking not implemented.
    x = emb.reshape(1, T * B_pad, emb.shape[-1]).astype(jnp.bfloat16)

    h0 = c0 = None
    for layer, lp in enumerate(params["lstm"]):
        out, h, c = bidir_lstm_layer(x, lp["wih"], lp["whh"], lp["b"], B_pad)
        if layer == 0:
            # PyTorch hidden[0:1]/hidden[1:2] = layer-0 fwd/bwd final states.
            h0, c0 = h, c
        x = out                                # (2, T*Bp, H): next layer input

    H = x.shape[-1]
    out_f = x[0].reshape(T, B_pad, H)
    out_b = x[1].reshape(T, B_pad, H)
    encoder_states = jnp.concatenate([out_f, out_b], axis=-1)[:, :B]
    encoder_states = encoder_states.astype(jnp.float32)       # (T, B, 2H)

    hid, cel = fc_heads(h0, c0,
                        params["fc_hidden_w"], params["fc_hidden_b"],
                        params["fc_cell_w"], params["fc_cell_b"])
    hidden = hid[:B][None]                                    # (1, B, H)
    cell = cel[:B][None]                                      # (1, B, H)
    return encoder_states, hidden, cell


# ---------------------------------------------------------------------------
# Main
# ---------------------------------------------------------------------------

if __name__ == "__main__":
    input_size = 20        # vocab
    embedding_size = 16
    hidden_size = 32
    num_layers = 2
    dropout = 0.1          # identity at inference
    T, B = 8, 2            # seq_len, batch

    key = jax.random.PRNGKey(0)
    pkey, skey = jax.random.split(key)
    params = init_encoder_params(pkey, input_size, embedding_size,
                                 hidden_size, num_layers)
    src = jax.random.randint(skey, (T, B), 0, input_size, dtype=jnp.int32)

    fwd = jax.jit(encoder_forward)
    encoder_states, hidden, cell = fwd(params, src)
    jax.block_until_ready((encoder_states, hidden, cell))

    assert encoder_states.shape == (T, B, 2 * hidden_size)
    assert hidden.shape == (1, B, hidden_size)
    assert cell.shape == (1, B, hidden_size)
    print("KERNEL_OK")
</pallas_src>

<mosaic_0001>
module attributes {stable_mosaic.version = 11 : i64} {
  func.func @_heads_kernel(%arg0: memref<2x8x32xf32, #tpu.memory_space<vmem>>, %arg1: memref<2x8x32xf32, #tpu.memory_space<vmem>>, %arg2: memref<2x32x32xf32, #tpu.memory_space<vmem>>, %arg3: memref<1x32xf32, #tpu.memory_space<vmem>>, %arg4: memref<2x32x32xf32, #tpu.memory_space<vmem>>, %arg5: memref<1x32xf32, #tpu.memory_space<vmem>>, %arg6: memref<8x32xf32, #tpu.memory_space<vmem>>, %arg7: memref<8x32xf32, #tpu.memory_space<vmem>>) attributes {dimension_semantics = [], scalar_prefetch = 0 : i64, scratch_operands = 0 : i64, tpu.core_type = #tpu.core_type<tc>} {
    %c0 = arith.constant 0 : index
    %c0_0 = arith.constant 0 : index
    %c0_1 = arith.constant 0 : index
    %0 = vector.load %arg0[%c0, %c0_0, %c0_1] : memref<2x8x32xf32, #tpu.memory_space<vmem>>, vector<1x8x32xf32>
    %1 = vector.shape_cast %0 : vector<1x8x32xf32> to vector<8x32xf32>
    %c0_2 = arith.constant 0 : index
    %c0_3 = arith.constant 0 : index
    %c0_4 = arith.constant 0 : index
    %2 = vector.load %arg2[%c0_2, %c0_3, %c0_4] : memref<2x32x32xf32, #tpu.memory_space<vmem>>, vector<1x32x32xf32>
    %3 = vector.shape_cast %2 : vector<1x32x32xf32> to vector<32x32xf32>
    %cst = arith.constant dense<0.000000e+00> : vector<8x32xf32>
    %4 = tpu.matmul %1, %3, %cst {dimension_numbers = #tpu.dot_dimension_numbers<[1], [0], [0], [1], [0, 0, 1, 1], [], []>} : vector<8x32xf32>, vector<32x32xf32>, vector<8x32xf32> -> vector<8x32xf32>
    %c1 = arith.constant 1 : index
    %c0_5 = arith.constant 0 : index
    %c0_6 = arith.constant 0 : index
    %5 = vector.load %arg0[%c1, %c0_5, %c0_6] : memref<2x8x32xf32, #tpu.memory_space<vmem>>, vector<1x8x32xf32>
    %6 = vector.shape_cast %5 : vector<1x8x32xf32> to vector<8x32xf32>
    %c1_7 = arith.constant 1 : index
    %c0_8 = arith.constant 0 : index
    %c0_9 = arith.constant 0 : index
    %7 = vector.load %arg2[%c1_7, %c0_8, %c0_9] : memref<2x32x32xf32, #tpu.memory_space<vmem>>, vector<1x32x32xf32>
    %8 = vector.shape_cast %7 : vector<1x32x32xf32> to vector<32x32xf32>
    %cst_10 = arith.constant dense<0.000000e+00> : vector<8x32xf32>
    %9 = tpu.matmul %6, %8, %cst_10 {dimension_numbers = #tpu.dot_dimension_numbers<[1], [0], [0], [1], [0, 0, 1, 1], [], []>} : vector<8x32xf32>, vector<32x32xf32>, vector<8x32xf32> -> vector<8x32xf32>
    %10 = arith.addf %4, %9 : vector<8x32xf32>
    %c0_11 = arith.constant 0 : index
    %c0_12 = arith.constant 0 : index
    %11 = vector.load %arg3[%c0_11, %c0_12] : memref<1x32xf32, #tpu.memory_space<vmem>>, vector<1x32xf32>
    %12 = vector.broadcast %11 : vector<1x32xf32> to vector<8x32xf32>
    %13 = arith.addf %10, %12 : vector<8x32xf32>
    %c0_13 = arith.constant 0 : index
    %c0_14 = arith.constant 0 : index
    %14 = vector.load %arg6[%c0_13, %c0_14] : memref<8x32xf32, #tpu.memory_space<vmem>>, vector<8x32xf32>
    tpu.vector_store %arg6[%c0_13, %c0_14], %13 {strides = array<i32>} : memref<8x32xf32, #tpu.memory_space<vmem>>, vector<8x32xf32>,
    %c0_15 = arith.constant 0 : index
    %c0_16 = arith.constant 0 : index
    %c0_17 = arith.constant 0 : index
    %15 = vector.load %arg1[%c0_15, %c0_16, %c0_17] : memref<2x8x32xf32, #tpu.memory_space<vmem>>, vector<1x8x32xf32>
    %16 = vector.shape_cast %15 : vector<1x8x32xf32> to vector<8x32xf32>
    %c0_18 = arith.constant 0 : index
    %c0_19 = arith.constant 0 : index
    %c0_20 = arith.constant 0 : index
    %17 = vector.load %arg4[%c0_18, %c0_19, %c0_20] : memref<2x32x32xf32, #tpu.memory_space<vmem>>, vector<1x32x32xf32>
    %18 = vector.shape_cast %17 : vector<1x32x32xf32> to vector<32x32xf32>
    %cst_21 = arith.constant dense<0.000000e+00> : vector<8x32xf32>
    %19 = tpu.matmul %16, %18, %cst_21 {dimension_numbers = #tpu.dot_dimension_numbers<[1], [0], [0], [1], [0, 0, 1, 1], [], []>} : vector<8x32xf32>, vector<32x32xf32>, vector<8x32xf32> -> vector<8x32xf32>
    %c1_22 = arith.constant 1 : index
    %c0_23 = arith.constant 0 : index
    %c0_24 = arith.constant 0 : index
    %20 = vector.load %arg1[%c1_22, %c0_23, %c0_24] : memref<2x8x32xf32, #tpu.memory_space<vmem>>, vector<1x8x32xf32>
    %21 = vector.shape_cast %20 : vector<1x8x32xf32> to vector<8x32xf32>
    %c1_25 = arith.constant 1 : index
    %c0_26 = arith.constant 0 : index
    %c0_27 = arith.constant 0 : index
    %22 = vector.load %arg4[%c1_25, %c0_26, %c0_27] : memref<2x32x32xf32, #tpu.memory_space<vmem>>, vector<1x32x32xf32>
    %23 = vector.shape_cast %22 : vector<1x32x32xf32> to vector<32x32xf32>
    %cst_28 = arith.constant dense<0.000000e+00> : vector<8x32xf32>
    %24 = tpu.matmul %21, %23, %cst_28 {dimension_numbers = #tpu.dot_dimension_numbers<[1], [0], [0], [1], [0, 0, 1, 1], [], []>} : vector<8x32xf32>, vector<32x32xf32>, vector<8x32xf32> -> vector<8x32xf32>
    %25 = arith.addf %19, %24 : vector<8x32xf32>
    %c0_29 = arith.constant 0 : index
    %c0_30 = arith.constant 0 : index
    %26 = vector.load %arg5[%c0_29, %c0_30] : memref<1x32xf32, #tpu.memory_space<vmem>>, vector<1x32xf32>
    %27 = vector.broadcast %26 : vector<1x32xf32> to vector<8x32xf32>
    %28 = arith.addf %25, %27 : vector<8x32xf32>
    %c0_31 = arith.constant 0 : index
    %c0_32 = arith.constant 0 : index
    %29 = vector.load %arg7[%c0_31, %c0_32] : memref<8x32xf32, #tpu.memory_space<vmem>>, vector<8x32xf32>
    tpu.vector_store %arg7[%c0_31, %c0_32], %28 {strides = array<i32>} : memref<8x32xf32, #tpu.memory_space<vmem>>, vector<8x32xf32>,
    return
  }
}

module attributes {stable_mosaic.version = 11 : i64} {
  func.func @_bidir_lstm_kernel(%arg0: i32, %arg1: memref<1x64x16xbf16, #tpu.memory_space<vmem>>, %arg2: memref<1x1x16x128xbf16, #tpu.memory_space<vmem>>, %arg3: memref<1x4x32x32xbf16, #tpu.memory_space<vmem>>, %arg4: memref<1x1x128xf32, #tpu.memory_space<vmem>>, %arg5: memref<1x64x32xbf16, #tpu.memory_space<vmem>>, %arg6: memref<1x8x32xf32, #tpu.memory_space<vmem>>, %arg7: memref<1x8x32xf32, #tpu.memory_space<vmem>>, %arg8: memref<64x32xf32, #tpu.memory_space<vmem>>, %arg9: memref<64x32xf32, #tpu.memory_space<vmem>>, %arg10: memref<64x32xf32, #tpu.memory_space<vmem>>, %arg11: memref<64x32xf32, #tpu.memory_space<vmem>>) attributes {dimension_semantics = [#tpu.dimension_semantics<parallel>], iteration_bounds = array<i64: 2>, scalar_prefetch = 0 : i64, scratch_operands = 4 : i64, tpu.core_type = #tpu.core_type<tc>, window_params = [{pipeline_mode = #tpu.pipeline_mode<synchronous>, transform_indices = @transform_0, window_bounds = array<i64: 1, 64, 16>}, {transform_indices = @transform_1, window_bounds = array<i64: 1, 1, 16, 128>}, {transform_indices = @transform_2, window_bounds = array<i64: 1, 4, 32, 32>}, {transform_indices = @transform_3, window_bounds = array<i64: 1, 1, 128>}, {transform_indices = @transform_4, window_bounds = array<i64: 1, 64, 32>}, {transform_indices = @transform_5, window_bounds = array<i64: 1, 8, 32>}, {transform_indices = @transform_6, window_bounds = array<i64: 1, 8, 32>}]} {
    %c0 = arith.constant 0 : index
    %c0_0 = arith.constant 0 : index
    %c0_1 = arith.constant 0 : index
    %0 = vector.load %arg1[%c0, %c0_0, %c0_1] : memref<1x64x16xbf16, #tpu.memory_space<vmem>>, vector<1x64x16xbf16>
    %1 = vector.shape_cast %0 : vector<1x64x16xbf16> to vector<64x16xbf16>
    %c0_2 = arith.constant 0 : index
    %c0_3 = arith.constant 0 : index
    %c0_4 = arith.constant 0 : index
    %c0_5 = arith.constant 0 : index
    %2 = vector.load %arg2[%c0_2, %c0_3, %c0_4, %c0_5] : memref<1x1x16x128xbf16, #tpu.memory_space<vmem>>, vector<1x1x16x128xbf16>
    %3 = vector.shape_cast %2 : vector<1x1x16x128xbf16> to vector<16x128xbf16>
    %cst = arith.constant dense<0.000000e+00> : vector<64x128xf32>
    %4 = tpu.matmul %1, %3, %cst {dimension_numbers = #tpu.dot_dimension_numbers<[1], [0], [0], [1], [0, 0, 1, 1], [], []>} : vector<64x16xbf16>, vector<16x128xbf16>, vector<64x128xf32> -> vector<64x128xf32>
    %c0_6 = arith.constant 0 : index
    %c0_7 = arith.constant 0 : index
    %c0_8 = arith.constant 0 : index
    %5 = vector.load %arg4[%c0_6, %c0_7, %c0_8] : memref<1x1x128xf32, #tpu.memory_space<vmem>>, vector<1x1x128xf32>
    %6 = vector.shape_cast %5 : vector<1x1x128xf32> to vector<1x128xf32>
    %7 = vector.broadcast %6 : vector<1x128xf32> to vector<64x128xf32>
    %8 = arith.addf %4, %7 : vector<64x128xf32>
    %9 = vector.extract_strided_slice %8 {offsets = [0, 0], sizes = [64, 32], strides = [1, 1]} : vector<64x128xf32> to vector<64x32xf32>
    %c0_9 = arith.constant 0 : index
    %c0_10 = arith.constant 0 : index
    %10 = vector.load %arg8[%c0_9, %c0_10] : memref<64x32xf32, #tpu.memory_space<vmem>>, vector<64x32xf32>
    tpu.vector_store %arg8[%c0_9, %c0_10], %9 {strides = array<i32>} : memref<64x32xf32, #tpu.memory_space<vmem>>, vector<64x32xf32>,
    %11 = vector.extract_strided_slice %8 {offsets = [0, 32], sizes = [64, 32], strides = [1, 1]} : vector<64x128xf32> to vector<64x32xf32>
    %c0_11 = arith.constant 0 : index
    %c0_12 = arith.constant 0 : index
    %12 = vector.load %arg9[%c0_11, %c0_12] : memref<64x32xf32, #tpu.memory_space<vmem>>, vector<64x32xf32>
    tpu.vector_store %arg9[%c0_11, %c0_12], %11 {strides = array<i32>} : memref<64x32xf32, #tpu.memory_space<vmem>>, vector<64x32xf32>,
    %13 = vector.extract_strided_slice %8 {offsets = [0, 64], sizes = [64, 32], strides = [1, 1]} : vector<64x128xf32> to vector<64x32xf32>
    %c0_13 = arith.constant 0 : index
    %c0_14 = arith.constant 0 : index
    %14 = vector.load %arg10[%c0_13, %c0_14] : memref<64x32xf32, #tpu.memory_space<vmem>>, vector<64x32xf32>
    tpu.vector_store %arg10[%c0_13, %c0_14], %13 {strides = array<i32>} : memref<64x32xf32, #tpu.memory_space<vmem>>, vector<64x32xf32>,
    %15 = vector.extract_strided_slice %8 {offsets = [0, 96], sizes = [64, 32], strides = [1, 1]} : vector<64x128xf32> to vector<64x32xf32>
    %c0_15 = arith.constant 0 : index
    %c0_16 = arith.constant 0 : index
    %16 = vector.load %arg11[%c0_15, %c0_16] : memref<64x32xf32, #tpu.memory_space<vmem>>, vector<64x32xf32>
    tpu.vector_store %arg11[%c0_15, %c0_16], %15 {strides = array<i32>} : memref<64x32xf32, #tpu.memory_space<vmem>>, vector<64x32xf32>,
    %cst_17 = arith.constant 0.000000e+00 : f32
    %17 = vector.broadcast %cst_17 : f32 to vector<8x32xf32>
    %cst_18 = arith.constant 0.000000e+00 : f32
    %18 = vector.broadcast %cst_18 : f32 to vector<8x32xf32>
    %c0_i32 = arith.constant 0 : i32
    %c8_i32 = arith.constant 8 : i32
    %19 = arith.addi %c0_i32, %c8_i32 : i32
    %c1_i32 = arith.constant 1 : i32
    %20:2 = scf.for %arg12 = %c0_i32 to %19 step %c1_i32 iter_args(%arg13 = %17, %arg14 = %18) -> (vector<8x32xf32>, vector<8x32xf32>)  : i32 {
      %c0_i32_26 = arith.constant 0 : i32
      %27 = arith.cmpi eq, %arg0, %c0_i32_26 : i32
      %c7_i32 = arith.constant 7 : i32
      %28 = arith.subi %c7_i32, %arg12 : i32
      %29 = arith.select %27, %arg12, %28 : i32
      %c8_i32_27 = arith.constant 8 : i32
      %30 = arith.muli %29, %c8_i32_27 : i32
      %31 = tpu.assume_multiple %30, 8 : i32
      %32 = arith.truncf %arg13 : vector<8x32xf32> to vector<8x32xbf16>
      %33 = arith.index_cast %31 : i32 to index
      %c0_28 = arith.constant 0 : index
      %34 = vector.load %arg8[%33, %c0_28] : memref<64x32xf32, #tpu.memory_space<vmem>>, vector<8x32xf32>
      %c0_29 = arith.constant 0 : index
      %c0_30 = arith.constant 0 : index
      %c0_31 = arith.constant 0 : index
      %c0_32 = arith.constant 0 : index
      %35 = vector.load %arg3[%c0_29, %c0_30, %c0_31, %c0_32] : memref<1x4x32x32xbf16, #tpu.memory_space<vmem>>, vector<1x1x32x32xbf16>
      %36 = vector.shape_cast %35 : vector<1x1x32x32xbf16> to vector<32x32xbf16>
      %cst_33 = arith.constant dense<0.000000e+00> : vector<8x32xf32>
      %37 = tpu.matmul %32, %36, %cst_33 {dimension_numbers = #tpu.dot_dimension_numbers<[1], [0], [0], [1], [0, 0, 1, 1], [], []>} : vector<8x32xbf16>, vector<32x32xbf16>, vector<8x32xf32> -> vector<8x32xf32>
      %38 = arith.addf %34, %37 : vector<8x32xf32>
      %39 = arith.index_cast %31 : i32 to index
      %c0_34 = arith.constant 0 : index
      %40 = vector.load %arg9[%39, %c0_34] : memref<64x32xf32, #tpu.memory_space<vmem>>, vector<8x32xf32>
      %c0_35 = arith.constant 0 : index
      %c1 = arith.constant 1 : index
      %c0_36 = arith.constant 0 : index
      %c0_37 = arith.constant 0 : index
      %41 = vector.load %arg3[%c0_35, %c1, %c0_36, %c0_37] : memref<1x4x32x32xbf16, #tpu.memory_space<vmem>>, vector<1x1x32x32xbf16>
      %42 = vector.shape_cast %41 : vector<1x1x32x32xbf16> to vector<32x32xbf16>
      %cst_38 = arith.constant dense<0.000000e+00> : vector<8x32xf32>
      %43 = tpu.matmul %32, %42, %cst_38 {dimension_numbers = #tpu.dot_dimension_numbers<[1], [0], [0], [1], [0, 0, 1, 1], [], []>} : vector<8x32xbf16>, vector<32x32xbf16>, vector<8x32xf32> -> vector<8x32xf32>
      %44 = arith.addf %40, %43 : vector<8x32xf32>
      %45 = arith.index_cast %31 : i32 to index
      %c0_39 = arith.constant 0 : index
      %46 = vector.load %arg10[%45, %c0_39] : memref<64x32xf32, #tpu.memory_space<vmem>>, vector<8x32xf32>
      %c0_40 = arith.constant 0 : index
      %c2 = arith.constant 2 : index
      %c0_41 = arith.constant 0 : index
      %c0_42 = arith.constant 0 : index
      %47 = vector.load %arg3[%c0_40, %c2, %c0_41, %c0_42] : memref<1x4x32x32xbf16, #tpu.memory_space<vmem>>, vector<1x1x32x32xbf16>
      %48 = vector.shape_cast %47 : vector<1x1x32x32xbf16> to vector<32x32xbf16>
      %cst_43 = arith.constant dense<0.000000e+00> : vector<8x32xf32>
      %49 = tpu.matmul %32, %48, %cst_43 {dimension_numbers = #tpu.dot_dimension_numbers<[1], [0], [0], [1], [0, 0, 1, 1], [], []>} : vector<8x32xbf16>, vector<32x32xbf16>, vector<8x32xf32> -> vector<8x32xf32>
      %50 = arith.addf %46, %49 : vector<8x32xf32>
      %51 = arith.index_cast %31 : i32 to index
      %c0_44 = arith.constant 0 : index
      %52 = vector.load %arg11[%51, %c0_44] : memref<64x32xf32, #tpu.memory_space<vmem>>, vector<8x32xf32>
      %c0_45 = arith.constant 0 : index
      %c3 = arith.constant 3 : index
      %c0_46 = arith.constant 0 : index
      %c0_47 = arith.constant 0 : index
      %53 = vector.load %arg3[%c0_45, %c3, %c0_46, %c0_47] : memref<1x4x32x32xbf16, #tpu.memory_space<vmem>>, vector<1x1x32x32xbf16>
      %54 = vector.shape_cast %53 : vector<1x1x32x32xbf16> to vector<32x32xbf16>
      %cst_48 = arith.constant dense<0.000000e+00> : vector<8x32xf32>
      %55 = tpu.matmul %32, %54, %cst_48 {dimension_numbers = #tpu.dot_dimension_numbers<[1], [0], [0], [1], [0, 0, 1, 1], [], []>} : vector<8x32xbf16>, vector<32x32xbf16>, vector<8x32xf32> -> vector<8x32xf32>
      %56 = arith.addf %52, %55 : vector<8x32xf32>
      %57 = arith.negf %38 : vector<8x32xf32>
      %58 = math.exp %57 : vector<8x32xf32>
      %cst_49 = arith.constant 1.000000e+00 : f32
      %59 = vector.broadcast %cst_49 : f32 to vector<8x32xf32>
      %60 = arith.addf %59, %58 : vector<8x32xf32>
      %61 = arith.divf %59, %60 : vector<8x32xf32>
      %62 = arith.negf %44 : vector<8x32xf32>
      %63 = math.exp %62 : vector<8x32xf32>
      %cst_50 = arith.constant 1.000000e+00 : f32
      %64 = vector.broadcast %cst_50 : f32 to vector<8x32xf32>
      %65 = arith.addf %64, %63 : vector<8x32xf32>
      %66 = arith.divf %64, %65 : vector<8x32xf32>
      %67 = math.tanh %50 : vector<8x32xf32>
      %68 = arith.negf %56 : vector<8x32xf32>
      %69 = math.exp %68 : vector<8x32xf32>
      %cst_51 = arith.constant 1.000000e+00 : f32
      %70 = vector.broadcast %cst_51 : f32 to vector<8x32xf32>
      %71 = arith.addf %70, %69 : vector<8x32xf32>
      %72 = arith.divf %70, %71 : vector<8x32xf32>
      %73 = arith.mulf %66, %arg14 : vector<8x32xf32>
      %74 = arith.mulf %61, %67 : vector<8x32xf32>
      %75 = arith.addf %73, %74 : vector<8x32xf32>
      %76 = math.tanh %75 : vector<8x32xf32>
      %77 = arith.mulf %72, %76 : vector<8x32xf32>
      %78 = arith.truncf %77 : vector<8x32xf32> to vector<8x32xbf16>
      %c0_52 = arith.constant 0 : index
      %79 = arith.index_cast %31 : i32 to index
      %c0_53 = arith.constant 0 : index
      %80 = vector.load %arg5[%c0_52, %79, %c0_53] : memref<1x64x32xbf16, #tpu.memory_space<vmem>>, vector<1x8x32xbf16>
      %81 = vector.shape_cast %80 : vector<1x8x32xbf16> to vector<8x32xbf16>
      %82 = vector.shape_cast %78 : vector<8x32xbf16> to vector<1x8x32xbf16>
      tpu.vector_store %arg5[%c0_52, %79, %c0_53], %82 {strides = array<i32>} : memref<1x64x32xbf16, #tpu.memory_space<vmem>>, vector<1x8x32xbf16>,
      scf.yield %77, %75 : vector<8x32xf32>, vector<8x32xf32>
    }
    %c8_i32_19 = arith.constant 8 : i32
    %c0_20 = arith.constant 0 : index
    %c0_21 = arith.constant 0 : index
    %c0_22 = arith.constant 0 : index
    %21 = vector.load %arg6[%c0_20, %c0_21, %c0_22] : memref<1x8x32xf32, #tpu.memory_space<vmem>>, vector<1x8x32xf32>
    %22 = vector.shape_cast %21 : vector<1x8x32xf32> to vector<8x32xf32>
    %23 = vector.shape_cast %20#0 : vector<8x32xf32> to vector<1x8x32xf32>
    tpu.vector_store %arg6[%c0_20, %c0_21, %c0_22], %23 {strides = array<i32>} : memref<1x8x32xf32, #tpu.memory_space<vmem>>, vector<1x8x32xf32>,
    %c0_23 = arith.constant 0 : index
    %c0_24 = arith.constant 0 : index
    %c0_25 = arith.constant 0 : index
    %24 = vector.load %arg7[%c0_23, %c0_24, %c0_25] : memref<1x8x32xf32, #tpu.memory_space<vmem>>, vector<1x8x32xf32>
    %25 = vector.shape_cast %24 : vector<1x8x32xf32> to vector<8x32xf32>
    %26 = vector.shape_cast %20#1 : vector<8x32xf32> to vector<1x8x32xf32>
    tpu.vector_store %arg7[%c0_23, %c0_24, %c0_25], %26 {strides = array<i32>} : memref<1x8x32xf32, #tpu.memory_space<vmem>>, vector<1x8x32xf32>,
    return
  }
  func.func @transform_0(%arg0: i32) -> (i32, i32, i32) {
    %c0_i32 = arith.constant 0 : i32
    %c0_i32_0 = arith.constant 0 : i32
    %c0_i32_1 = arith.constant 0 : i32
    %c0_i32_2 = arith.constant 0 : i32
    return %c0_i32, %c0_i32_0, %c0_i32_1 : i32, i32, i32
  }
  func.func @transform_1(%arg0: i32) -> (i32, i32, i32, i32) {
    %c0_i32 = arith.constant 0 : i32
    %c0_i32_0 = arith.constant 0 : i32
    %c0_i32_1 = arith.constant 0 : i32
    %c0_i32_2 = arith.constant 0 : i32
    return %arg0, %c0_i32, %c0_i32_0, %c0_i32_1 : i32, i32, i32, i32
  }
  func.func @transform_2(%arg0: i32) -> (i32, i32, i32, i32) {
    %c0_i32 = arith.constant 0 : i32
    %c0_i32_0 = arith.constant 0 : i32
    %c0_i32_1 = arith.constant 0 : i32
    %c0_i32_2 = arith.constant 0 : i32
    return %arg0, %c0_i32, %c0_i32_0, %c0_i32_1 : i32, i32, i32, i32
  }
  func.func @transform_3(%arg0: i32) -> (i32, i32, i32) {
    %c0_i32 = arith.constant 0 : i32
    %c0_i32_0 = arith.constant 0 : i32
    %c0_i32_1 = arith.constant 0 : i32
    return %arg0, %c0_i32, %c0_i32_0 : i32, i32, i32
  }
  func.func @transform_4(%arg0: i32) -> (i32, i32, i32) {
    %c0_i32 = arith.constant 0 : i32
    %c0_i32_0 = arith.constant 0 : i32
    %c0_i32_1 = arith.constant 0 : i32
    return %arg0, %c0_i32, %c0_i32_0 : i32, i32, i32
  }
  func.func @transform_5(%arg0: i32) -> (i32, i32, i32) {
    %c0_i32 = arith.constant 0 : i32
    %c0_i32_0 = arith.constant 0 : i32
    %c0_i32_1 = arith.constant 0 : i32
    return %arg0, %c0_i32, %c0_i32_0 : i32, i32, i32
  }
  func.func @transform_6(%arg0: i32) -> (i32, i32, i32) {
    %c0_i32 = arith.constant 0 : i32
    %c0_i32_0 = arith.constant 0 : i32
    %c0_i32_1 = arith.constant 0 : i32
    return %arg0, %c0_i32, %c0_i32_0 : i32, i32, i32
  }
}

module attributes {stable_mosaic.version = 11 : i64} {
  func.func @_bidir_lstm_kernel(%arg0: i32, %arg1: memref<2x64x32xbf16, #tpu.memory_space<vmem>>, %arg2: memref<1x2x32x128xbf16, #tpu.memory_space<vmem>>, %arg3: memref<1x4x32x32xbf16, #tpu.memory_space<vmem>>, %arg4: memref<1x1x128xf32, #tpu.memory_space<vmem>>, %arg5: memref<1x64x32xbf16, #tpu.memory_space<vmem>>, %arg6: memref<1x8x32xf32, #tpu.memory_space<vmem>>, %arg7: memref<1x8x32xf32, #tpu.memory_space<vmem>>, %arg8: memref<64x32xf32, #tpu.memory_space<vmem>>, %arg9: memref<64x32xf32, #tpu.memory_space<vmem>>, %arg10: memref<64x32xf32, #tpu.memory_space<vmem>>, %arg11: memref<64x32xf32, #tpu.memory_space<vmem>>) attributes {dimension_semantics = [#tpu.dimension_semantics<parallel>], iteration_bounds = array<i64: 2>, scalar_prefetch = 0 : i64, scratch_operands = 4 : i64, tpu.core_type = #tpu.core_type<tc>, window_params = [{pipeline_mode = #tpu.pipeline_mode<synchronous>, transform_indices = @transform_0, window_bounds = array<i64: 2, 64, 32>}, {transform_indices = @transform_1, window_bounds = array<i64: 1, 2, 32, 128>}, {transform_indices = @transform_2, window_bounds = array<i64: 1, 4, 32, 32>}, {transform_indices = @transform_3, window_bounds = array<i64: 1, 1, 128>}, {transform_indices = @transform_4, window_bounds = array<i64: 1, 64, 32>}, {transform_indices = @transform_5, window_bounds = array<i64: 1, 8, 32>}, {transform_indices = @transform_6, window_bounds = array<i64: 1, 8, 32>}]} {
    %c0 = arith.constant 0 : index
    %c0_0 = arith.constant 0 : index
    %c0_1 = arith.constant 0 : index
    %0 = vector.load %arg1[%c0, %c0_0, %c0_1] : memref<2x64x32xbf16, #tpu.memory_space<vmem>>, vector<1x64x32xbf16>
    %1 = vector.shape_cast %0 : vector<1x64x32xbf16> to vector<64x32xbf16>
    %c0_2 = arith.constant 0 : index
    %c0_3 = arith.constant 0 : index
    %c0_4 = arith.constant 0 : index
    %c0_5 = arith.constant 0 : index
    %2 = vector.load %arg2[%c0_2, %c0_3, %c0_4, %c0_5] : memref<1x2x32x128xbf16, #tpu.memory_space<vmem>>, vector<1x1x32x128xbf16>
    %3 = vector.shape_cast %2 : vector<1x1x32x128xbf16> to vector<32x128xbf16>
    %cst = arith.constant dense<0.000000e+00> : vector<64x128xf32>
    %4 = tpu.matmul %1, %3, %cst {dimension_numbers = #tpu.dot_dimension_numbers<[1], [0], [0], [1], [0, 0, 1, 1], [], []>} : vector<64x32xbf16>, vector<32x128xbf16>, vector<64x128xf32> -> vector<64x128xf32>
    %c1 = arith.constant 1 : index
    %c0_6 = arith.constant 0 : index
    %c0_7 = arith.constant 0 : index
    %5 = vector.load %arg1[%c1, %c0_6, %c0_7] : memref<2x64x32xbf16, #tpu.memory_space<vmem>>, vector<1x64x32xbf16>
    %6 = vector.shape_cast %5 : vector<1x64x32xbf16> to vector<64x32xbf16>
    %c0_8 = arith.constant 0 : index
    %c1_9 = arith.constant 1 : index
    %c0_10 = arith.constant 0 : index
    %c0_11 = arith.constant 0 : index
    %7 = vector.load %arg2[%c0_8, %c1_9, %c0_10, %c0_11] : memref<1x2x32x128xbf16, #tpu.memory_space<vmem>>, vector<1x1x32x128xbf16>
    %8 = vector.shape_cast %7 : vector<1x1x32x128xbf16> to vector<32x128xbf16>
    %cst_12 = arith.constant dense<0.000000e+00> : vector<64x128xf32>
    %9 = tpu.matmul %6, %8, %cst_12 {dimension_numbers = #tpu.dot_dimension_numbers<[1], [0], [0], [1], [0, 0, 1, 1], [], []>} : vector<64x32xbf16>, vector<32x128xbf16>, vector<64x128xf32> -> vector<64x128xf32>
    %10 = arith.addf %4, %9 : vector<64x128xf32>
    %c0_13 = arith.constant 0 : index
    %c0_14 = arith.constant 0 : index
    %c0_15 = arith.constant 0 : index
    %11 = vector.load %arg4[%c0_13, %c0_14, %c0_15] : memref<1x1x128xf32, #tpu.memory_space<vmem>>, vector<1x1x128xf32>
    %12 = vector.shape_cast %11 : vector<1x1x128xf32> to vector<1x128xf32>
    %13 = vector.broadcast %12 : vector<1x128xf32> to vector<64x128xf32>
    %14 = arith.addf %10, %13 : vector<64x128xf32>
    %15 = vector.extract_strided_slice %14 {offsets = [0, 0], sizes = [64, 32], strides = [1, 1]} : vector<64x128xf32> to vector<64x32xf32>
    %c0_16 = arith.constant 0 : index
    %c0_17 = arith.constant 0 : index
    %16 = vector.load %arg8[%c0_16, %c0_17] : memref<64x32xf32, #tpu.memory_space<vmem>>, vector<64x32xf32>
    tpu.vector_store %arg8[%c0_16, %c0_17], %15 {strides = array<i32>} : memref<64x32xf32, #tpu.memory_space<vmem>>, vector<64x32xf32>,
    %17 = vector.extract_strided_slice %14 {offsets = [0, 32], sizes = [64, 32], strides = [1, 1]} : vector<64x128xf32> to vector<64x32xf32>
    %c0_18 = arith.constant 0 : index
    %c0_19 = arith.constant 0 : index
    %18 = vector.load %arg9[%c0_18, %c0_19] : memref<64x32xf32, #tpu.memory_space<vmem>>, vector<64x32xf32>
    tpu.vector_store %arg9[%c0_18, %c0_19], %17 {strides = array<i32>} : memref<64x32xf32, #tpu.memory_space<vmem>>, vector<64x32xf32>,
    %19 = vector.extract_strided_slice %14 {offsets = [0, 64], sizes = [64, 32], strides = [1, 1]} : vector<64x128xf32> to vector<64x32xf32>
    %c0_20 = arith.constant 0 : index
    %c0_21 = arith.constant 0 : index
    %20 = vector.load %arg10[%c0_20, %c0_21] : memref<64x32xf32, #tpu.memory_space<vmem>>, vector<64x32xf32>
    tpu.vector_store %arg10[%c0_20, %c0_21], %19 {strides = array<i32>} : memref<64x32xf32, #tpu.memory_space<vmem>>, vector<64x32xf32>,
    %21 = vector.extract_strided_slice %14 {offsets = [0, 96], sizes = [64, 32], strides = [1, 1]} : vector<64x128xf32> to vector<64x32xf32>
    %c0_22 = arith.constant 0 : index
    %c0_23 = arith.constant 0 : index
    %22 = vector.load %arg11[%c0_22, %c0_23] : memref<64x32xf32, #tpu.memory_space<vmem>>, vector<64x32xf32>
    tpu.vector_store %arg11[%c0_22, %c0_23], %21 {strides = array<i32>} : memref<64x32xf32, #tpu.memory_space<vmem>>, vector<64x32xf32>,
    %cst_24 = arith.constant 0.000000e+00 : f32
    %23 = vector.broadcast %cst_24 : f32 to vector<8x32xf32>
    %cst_25 = arith.constant 0.000000e+00 : f32
    %24 = vector.broadcast %cst_25 : f32 to vector<8x32xf32>
    %c0_i32 = arith.constant 0 : i32
    %c8_i32 = arith.constant 8 : i32
    %25 = arith.addi %c0_i32, %c8_i32 : i32
    %c1_i32 = arith.constant 1 : i32
    %26:2 = scf.for %arg12 = %c0_i32 to %25 step %c1_i32 iter_args(%arg13 = %23, %arg14 = %24) -> (vector<8x32xf32>, vector<8x32xf32>)  : i32 {
      %c0_i32_33 = arith.constant 0 : i32
      %33 = arith.cmpi eq, %arg0, %c0_i32_33 : i32
      %c7_i32 = arith.constant 7 : i32
      %34 = arith.subi %c7_i32, %arg12 : i32
      %35 = arith.select %33, %arg12, %34 : i32
      %c8_i32_34 = arith.constant 8 : i32
      %36 = arith.muli %35, %c8_i32_34 : i32
      %37 = tpu.assume_multiple %36, 8 : i32
      %38 = arith.truncf %arg13 : vector<8x32xf32> to vector<8x32xbf16>
      %39 = arith.index_cast %37 : i32 to index
      %c0_35 = arith.constant 0 : index
      %40 = vector.load %arg8[%39, %c0_35] : memref<64x32xf32, #tpu.memory_space<vmem>>, vector<8x32xf32>
      %c0_36 = arith.constant 0 : index
      %c0_37 = arith.constant 0 : index
      %c0_38 = arith.constant 0 : index
      %c0_39 = arith.constant 0 : index
      %41 = vector.load %arg3[%c0_36, %c0_37, %c0_38, %c0_39] : memref<1x4x32x32xbf16, #tpu.memory_space<vmem>>, vector<1x1x32x32xbf16>
      %42 = vector.shape_cast %41 : vector<1x1x32x32xbf16> to vector<32x32xbf16>
      %cst_40 = arith.constant dense<0.000000e+00> : vector<8x32xf32>
      %43 = tpu.matmul %38, %42, %cst_40 {dimension_numbers = #tpu.dot_dimension_numbers<[1], [0], [0], [1], [0, 0, 1, 1], [], []>} : vector<8x32xbf16>, vector<32x32xbf16>, vector<8x32xf32> -> vector<8x32xf32>
      %44 = arith.addf %40, %43 : vector<8x32xf32>
      %45 = arith.index_cast %37 : i32 to index
      %c0_41 = arith.constant 0 : index
      %46 = vector.load %arg9[%45, %c0_41] : memref<64x32xf32, #tpu.memory_space<vmem>>, vector<8x32xf32>
      %c0_42 = arith.constant 0 : index
      %c1_43 = arith.constant 1 : index
      %c0_44 = arith.constant 0 : index
      %c0_45 = arith.constant 0 : index
      %47 = vector.load %arg3[%c0_42, %c1_43, %c0_44, %c0_45] : memref<1x4x32x32xbf16, #tpu.memory_space<vmem>>, vector<1x1x32x32xbf16>
      %48 = vector.shape_cast %47 : vector<1x1x32x32xbf16> to vector<32x32xbf16>
      %cst_46 = arith.constant dense<0.000000e+00> : vector<8x32xf32>
      %49 = tpu.matmul %38, %48, %cst_46 {dimension_numbers = #tpu.dot_dimension_numbers<[1], [0], [0], [1], [0, 0, 1, 1], [], []>} : vector<8x32xbf16>, vector<32x32xbf16>, vector<8x32xf32> -> vector<8x32xf32>
      %50 = arith.addf %46, %49 : vector<8x32xf32>
      %51 = arith.index_cast %37 : i32 to index
      %c0_47 = arith.constant 0 : index
      %52 = vector.load %arg10[%51, %c0_47] : memref<64x32xf32, #tpu.memory_space<vmem>>, vector<8x32xf32>
      %c0_48 = arith.constant 0 : index
      %c2 = arith.constant 2 : index
      %c0_49 = arith.constant 0 : index
      %c0_50 = arith.constant 0 : index
      %53 = vector.load %arg3[%c0_48, %c2, %c0_49, %c0_50] : memref<1x4x32x32xbf16, #tpu.memory_space<vmem>>, vector<1x1x32x32xbf16>
      %54 = vector.shape_cast %53 : vector<1x1x32x32xbf16> to vector<32x32xbf16>
      %cst_51 = arith.constant dense<0.000000e+00> : vector<8x32xf32>
      %55 = tpu.matmul %38, %54, %cst_51 {dimension_numbers = #tpu.dot_dimension_numbers<[1], [0], [0], [1], [0, 0, 1, 1], [], []>} : vector<8x32xbf16>, vector<32x32xbf16>, vector<8x32xf32> -> vector<8x32xf32>
      %56 = arith.addf %52, %55 : vector<8x32xf32>
      %57 = arith.index_cast %37 : i32 to index
      %c0_52 = arith.constant 0 : index
      %58 = vector.load %arg11[%57, %c0_52] : memref<64x32xf32, #tpu.memory_space<vmem>>, vector<8x32xf32>
      %c0_53 = arith.constant 0 : index
      %c3 = arith.constant 3 : index
      %c0_54 = arith.constant 0 : index
      %c0_55 = arith.constant 0 : index
      %59 = vector.load %arg3[%c0_53, %c3, %c0_54, %c0_55] : memref<1x4x32x32xbf16, #tpu.memory_space<vmem>>, vector<1x1x32x32xbf16>
      %60 = vector.shape_cast %59 : vector<1x1x32x32xbf16> to vector<32x32xbf16>
      %cst_56 = arith.constant dense<0.000000e+00> : vector<8x32xf32>
      %61 = tpu.matmul %38, %60, %cst_56 {dimension_numbers = #tpu.dot_dimension_numbers<[1], [0], [0], [1], [0, 0, 1, 1], [], []>} : vector<8x32xbf16>, vector<32x32xbf16>, vector<8x32xf32> -> vector<8x32xf32>
      %62 = arith.addf %58, %61 : vector<8x32xf32>
      %63 = arith.negf %44 : vector<8x32xf32>
      %64 = math.exp %63 : vector<8x32xf32>
      %cst_57 = arith.constant 1.000000e+00 : f32
      %65 = vector.broadcast %cst_57 : f32 to vector<8x32xf32>
      %66 = arith.addf %65, %64 : vector<8x32xf32>
      %67 = arith.divf %65, %66 : vector<8x32xf32>
      %68 = arith.negf %50 : vector<8x32xf32>
      %69 = math.exp %68 : vector<8x32xf32>
      %cst_58 = arith.constant 1.000000e+00 : f32
      %70 = vector.broadcast %cst_58 : f32 to vector<8x32xf32>
      %71 = arith.addf %70, %69 : vector<8x32xf32>
      %72 = arith.divf %70, %71 : vector<8x32xf32>
      %73 = math.tanh %56 : vector<8x32xf32>
      %74 = arith.negf %62 : vector<8x32xf32>
      %75 = math.exp %74 : vector<8x32xf32>
      %cst_59 = arith.constant 1.000000e+00 : f32
      %76 = vector.broadcast %cst_59 : f32 to vector<8x32xf32>
      %77 = arith.addf %76, %75 : vector<8x32xf32>
      %78 = arith.divf %76, %77 : vector<8x32xf32>
      %79 = arith.mulf %72, %arg14 : vector<8x32xf32>
      %80 = arith.mulf %67, %73 : vector<8x32xf32>
      %81 = arith.addf %79, %80 : vector<8x32xf32>
      %82 = math.tanh %81 : vector<8x32xf32>
      %83 = arith.mulf %78, %82 : vector<8x32xf32>
      %84 = arith.truncf %83 : vector<8x32xf32> to vector<8x32xbf16>
      %c0_60 = arith.constant 0 : index
      %85 = arith.index_cast %37 : i32 to index
      %c0_61 = arith.constant 0 : index
      %86 = vector.load %arg5[%c0_60, %85, %c0_61] : memref<1x64x32xbf16, #tpu.memory_space<vmem>>, vector<1x8x32xbf16>
      %87 = vector.shape_cast %86 : vector<1x8x32xbf16> to vector<8x32xbf16>
      %88 = vector.shape_cast %84 : vector<8x32xbf16> to vector<1x8x32xbf16>
      tpu.vector_store %arg5[%c0_60, %85, %c0_61], %88 {strides = array<i32>} : memref<1x64x32xbf16, #tpu.memory_space<vmem>>, vector<1x8x32xbf16>,
      scf.yield %83, %81 : vector<8x32xf32>, vector<8x32xf32>
    }
    %c8_i32_26 = arith.constant 8 : i32
    %c0_27 = arith.constant 0 : index
    %c0_28 = arith.constant 0 : index
    %c0_29 = arith.constant 0 : index
    %27 = vector.load %arg6[%c0_27, %c0_28, %c0_29] : memref<1x8x32xf32, #tpu.memory_space<vmem>>, vector<1x8x32xf32>
    %28 = vector.shape_cast %27 : vector<1x8x32xf32> to vector<8x32xf32>
    %29 = vector.shape_cast %26#0 : vector<8x32xf32> to vector<1x8x32xf32>
    tpu.vector_store %arg6[%c0_27, %c0_28, %c0_29], %29 {strides = array<i32>} : memref<1x8x32xf32, #tpu.memory_space<vmem>>, vector<1x8x32xf32>,
    %c0_30 = arith.constant 0 : index
    %c0_31 = arith.constant 0 : index
    %c0_32 = arith.constant 0 : index
    %30 = vector.load %arg7[%c0_30, %c0_31, %c0_32] : memref<1x8x32xf32, #tpu.memory_space<vmem>>, vector<1x8x32xf32>
    %31 = vector.shape_cast %30 : vector<1x8x32xf32> to vector<8x32xf32>
    %32 = vector.shape_cast %26#1 : vector<8x32xf32> to vector<1x8x32xf32>
    tpu.vector_store %arg7[%c0_30, %c0_31, %c0_32], %32 {strides = array<i32>} : memref<1x8x32xf32, #tpu.memory_space<vmem>>, vector<1x8x32xf32>,
    return
  }
  func.func @transform_0(%arg0: i32) -> (i32, i32, i32) {
    %c0_i32 = arith.constant 0 : i32
    %c0_i32_0 = arith.constant 0 : i32
    %c0_i32_1 = arith.constant 0 : i32
    %c0_i32_2 = arith.constant 0 : i32
    return %c0_i32, %c0_i32_0, %c0_i32_1 : i32, i32, i32
  }
  func.func @transform_1(%arg0: i32) -> (i32, i32, i32, i32) {
    %c0_i32 = arith.constant 0 : i32
    %c0_i32_0 = arith.constant 0 : i32
    %c0_i32_1 = arith.constant 0 : i32
    %c0_i32_2 = arith.constant 0 : i32
    return %arg0, %c0_i32, %c0_i32_0, %c0_i32_1 : i32, i32, i32, i32
  }
  func.func @transform_2(%arg0: i32) -> (i32, i32, i32, i32) {
    %c0_i32 = arith.constant 0 : i32
    %c0_i32_0 = arith.constant 0 : i32
    %c0_i32_1 = arith.constant 0 : i32
    %c0_i32_2 = arith.constant 0 : i32
    return %arg0, %c0_i32, %c0_i32_0, %c0_i32_1 : i32, i32, i32, i32
  }
  func.func @transform_3(%arg0: i32) -> (i32, i32, i32) {
    %c0_i32 = arith.constant 0 : i32
    %c0_i32_0 = arith.constant 0 : i32
    %c0_i32_1 = arith.constant 0 : i32
    return %arg0, %c0_i32, %c0_i32_0 : i32, i32, i32
  }
  func.func @transform_4(%arg0: i32) -> (i32, i32, i32) {
    %c0_i32 = arith.constant 0 : i32
    %c0_i32_0 = arith.constant 0 : i32
    %c0_i32_1 = arith.constant 0 : i32
    return %arg0, %c0_i32, %c0_i32_0 : i32, i32, i32
  }
  func.func @transform_5(%arg0: i32) -> (i32, i32, i32) {
    %c0_i32 = arith.constant 0 : i32
    %c0_i32_0 = arith.constant 0 : i32
    %c0_i32_1 = arith.constant 0 : i32
    return %arg0, %c0_i32, %c0_i32_0 : i32, i32, i32
  }
  func.func @transform_6(%arg0: i32) -> (i32, i32, i32) {
    %c0_i32 = arith.constant 0 : i32
    %c0_i32_0 = arith.constant 0 : i32
    %c0_i32_1 = arith.constant 0 : i32
    return %arg0, %c0_i32, %c0_i32_0 : i32, i32, i32
  }
}

</mosaic_0001>

<bundles_post_ra>
// kernel: encoder_forward.5
= control target key start
LH: loop header
LB: loop body
LE: loop exit
PB: predicated region body
PF: predicated region fallthrough
CT: control target
= control target key end

     0   :  { %vm37_vm0 = vcmask 261120   ;;  %s296_s4 = inlined_call_operand.vmem [shape: f32[2,32,32], index: 4, kind: input, shape index: {}]   ;;  %s297_s2 = inlined_call_operand.vmem [shape: f32[2,32,32], index: 2, kind: input, shape index: {}]   ;;  %s298_s1 = inlined_call_operand.vmem [shape: f32[2,8,32], index: 1, kind: input, shape index: {}]   ;;  %s299_s0 = inlined_call_operand.vmem [shape: f32[2,8,32], index: 0, kind: input, shape index: {}]   ;;  %s300_s3 = inlined_call_operand.vmem [shape: f32[1,32], index: 3, kind: input, shape index: {}]   ;;  %s301_s5 = inlined_call_operand.vmem [shape: f32[1,32], index: 5, kind: input, shape index: {}]   ;;  %s302_s6 = inlined_call_operand.vmem [shape: f32[8,32], index: 6, kind: output, shape index: {0}]   ;;  %s303_s7 = inlined_call_operand.vmem [shape: f32[8,32], index: 7, kind: output, shape index: {1}]  }
   0x1   :  { %v173_v0 = vld [vmem:[%s296_s4 + $0x38] sm:$0xff]  ;;  %v172_v2 = vld [vmem:[%s296_s4 + $0x30] sm:$0xff]  ;;  %v171_v4 = vld [vmem:[%s296_s4 + $0x28] sm:$0xff] }
   0x2   :  { %v94_v1 = vld [vmem:[%s296_s4 + $0x18] sm:$0xff]  ;;  %117 = vmatpush.msra.mxu2 %v173_v0  ;;  %v93_v3 = vld [vmem:[%s296_s4 + $0x10] sm:$0xff]  ;;  %v92_v5 = vld [vmem:[%s296_s4 + $0x8] sm:$0xff] }
   0x3   :  { %140 = vmatpush.msra.mxu3 %v94_v1  ;;  %v166_v6 = vld [vmem:[%s297_s2 + $0x38] sm:$0xff]  ;;  %v170_v8 = vld [vmem:[%s296_s4 + $0x20] sm:$0xff]  ;;  %v165_v10 = vld [vmem:[%s297_s2 + $0x30] sm:$0xff] }
   0x4   :  { %v29_v7 = vld [vmem:[%s297_s2 + $0x18] sm:$0xff]  ;;  %118 = vmatpush.msra.mxu2 %v172_v2  ;;  %53 = vmatpush.msra.mxu0 %v166_v6  ;;  %v91_v9 = vld [vmem:[%s296_s4] sm:$0xff]  ;;  %v28_v11 = vld [vmem:[%s297_s2 + $0x10] sm:$0xff] }
   0x5   :  { %141 = vmatpush.msra.mxu3 %v93_v3  ;;  %76 = vmatpush.msra.mxu1 %v29_v7  ;;  %v169_v12 = vld [vmem:[%s298_s1 + $0x8] sm:$0xff]  ;;  %v90_v13 = vld [vmem:[%s298_s1] sm:$0xff] }
   0x6   :  { %119 = vmatpush.msra.mxu2 %v171_v4  ;;  %54 = vmatpush.msra.mxu0 %v165_v10  ;;  %v164_v14 = vld [vmem:[%s297_s2 + $0x28] sm:$0xff]  ;;  %v163_v16 = vld [vmem:[%s297_s2 + $0x20] sm:$0xff] }
   0x7   :  { %142 = vmatpush.msra.mxu3 %v92_v5  ;;  %77 = vmatpush.msra.mxu1 %v28_v11  ;;  %v27_v15 = vld [vmem:[%s297_s2 + $0x8] sm:$0xff]  ;;  %v26_v17 = vld [vmem:[%s297_s2] sm:$0xff] }
   0x8   :  { %120 = vmatpush.msra.mxu2 %v170_v8  ;;  %55 = vmatpush.msra.mxu0 %v164_v14  ;;  %v162_v18 = vld [vmem:[%s299_s0 + $0x8] sm:$0xff]  ;;  %v25_v19 = vld [vmem:[%s299_s0] sm:$0xff] }
   0x9   :  { %143 = vmatpush.msra.mxu3 %v91_v9  ;;  %174 = vmatmul.msk.f32.vlgmr.msra.gmra.mxu2 %vm37_vm0, %v169_v12  ;;  %v176_v20 = vld [vmem:[%s300_s3] ss:$0 sm:$0xff] }
   0xa   :  { %175 = vmatmul.msk.f32.vlgmr.msra.gmra.mxu3 %vm37_vm0, %v90_v13  ;;  %78 = vmatpush.msra.mxu1 %v27_v15  ;;  %v177_v24 = vld [vmem:[%s301_s5] ss:$0 sm:$0xff] }
   0xb   :  { %56 = vmatpush.msra.mxu0 %v163_v16 }
   0xc   :  { %79 = vmatpush.msra.mxu1 %v26_v17  ;;  %167 = vmatmul.msk.f32.vlgmr.msra.gmra.mxu0 %vm37_vm0, %v162_v18 }
   0xd   :  { %168 = vmatmul.msk.f32.vlgmr.msra.gmra.mxu1 %vm37_vm0, %v25_v19 }
  0x89   :  { %v58_v21 = vpop.f32.mrf.mxu0 }
  0x8a   :  { %v81_v22 = vpop.f32.mrf.mxu1 }
  0x8b   :  { %v82_v23 = vadd.f32 %v81_v22, %v58_v21 }
  0x8c   :  { %v122_v25 = vpop.f32.mrf.mxu2 }
  0x8d   :  { %v145_v26 = vpop.f32.mrf.mxu3  ;;  %v88_v27 = vadd.f32 %v176_v20, %v82_v23 }
  0x8e   :  { %v146_v28 = vadd.f32 %v145_v26, %v122_v25 }
  0x8f   :  { %89 = vst.msk [vmem:[%s302_s6] sm:$0xff] %vm37_vm0, %v88_v27 }
  0x90   :  { %v152_v29 = vadd.f32 %v177_v24, %v146_v28 }
  0x92   :  { %153 = vst.msk [vmem:[%s303_s7] sm:$0xff] %vm37_vm0, %v152_v29 }

// kernel: encoder_forward.3
= control target key start
LH: loop header
LB: loop body
LE: loop exit
PB: predicated region body
PF: predicated region fallthrough
CT: control target
= control target key end

     0   :  { %s1114_s21 = smov 0   ;;  %s1272_s0 = inlined_call_operand.vmem [shape: bf16[1,64,16], index: 0, kind: input, shape index: {}]   ;;  %s1273_s1 = inlined_call_operand.vmem [shape: bf16[2,1,16,128], index: 1, kind: input, shape index: {}]   ;;  %s1274_s2 = inlined_call_operand.vmem [shape: bf16[2,4,32,32], index: 2, kind: input, shape index: {}]   ;;  %s1275_s3 = inlined_call_operand.vmem [shape: f32[2,1,128], index: 3, kind: input, shape index: {}]   ;;  %s1276_s4 = inlined_call_operand.vmem [shape: bf16[2,64,32], index: 4, kind: output, shape index: {0}]   ;;  %s1277_s5 = inlined_call_operand.vmem [shape: f32[2,8,32], index: 5, kind: output, shape index: {1}]   ;;  %s1278_s6 = inlined_call_operand.vmem [shape: f32[2,8,32], index: 6, kind: output, shape index: {2}]  }
   0x1 LB: > { %s1120_s22 = sadd.s32 4294967295, %s1062_s21   ;;  %p885_p0 = scmp.ge.s32.totalorder %s1062_s21, 1  ;;  %s1062_s21 = sphi %s1114_s21, %s17_s21  }
   0x2   : > { %p235_p1 = scmp.lt.s32.totalorder %s1062_s21, 3 }
   0x4   : > { %p236_p2 = pnand %p885_p0, %p235_p1 }
   0x5   : > { %p281_p3 = scmp.lt.s32.totalorder (!%p236_p2), %s1120_s22, 1  ;;  %s1076_s9 = smov (!%p236_p2), 96  }
   0x6   : > { %239 = sbr.rel (%p236_p2) target bundleno = 501 (0x1f5), region = 36  ;;  %s1217_s12 = smov (!%p236_p2), 0  }
   0xb   : > { %s282_s23 = scalar_select %p281_p3, %s1120_s22, 1  ;;  %v976_v1 = vld [vmem:[%s1272_s0] sm:$0xff]  ;;  %v977_v2 = vld [vmem:[%s1272_s0 + $0x8] sm:$0xff]  ;;  %vm348_vm0 = vcmask 130048   ;;  %v978_v3 = vld [vmem:[%s1272_s0 + $0x10] sm:$0xff]  ;;  %vm390_vm1 = vcmask 261120  }
   0xc   : > { %v979_v4 = vld [vmem:[%s1272_s0 + $0x18] sm:$0xff]  ;;  %v1213_v46 = vmov 0.0   ;;  %v1215_v47 = vmov 0.0  }
   0xd   : > { %s1126_s24 = sshll.u32 %s282_s23, 3  ;;  %s974_s25 = sshll.u32 %s282_s23, 6 }
   0xe   : > { %s285_s28 = scalar_lea.vmem %s1273_s1, %s1126_s24  ;;  %s1135_s7 = scalar_lea.vmem %s1274_s2, %s974_s25 }
   0xf   : > { %s293_s10 = scalar_lea.vmem %s1275_s3, %s282_s23  ;;  %s975_s11 = sshll.u32 %s282_s23, 5  ;;  %v980_v0 = vld [vmem:[%s285_s28] sm:$0xff] }
  0x10   : > { %s1143_s14 = scalar_lea.vmem %s1276_s4, %s975_s11  ;;  %s302_s17 = scalar_lea.vmem %s1277_s5, %s1126_s24  ;;  %368 = vmatpush.bf16.msra.mxu0 %v980_v0  ;;  %989 = vmatpush.bf16.msra.mxu1 %v980_v0  ;;  %v1027_v5 = vld [vmem:[%s293_s10] ss:$0 sm:$0xff] }
  0x11   : > { %s306_s27 = scalar_lea.vmem %s1278_s6, %s1126_s24  ;;  %990 = vmatpush.bf16.msra.mxu2 %v980_v0  ;;  %991 = vmatpush.bf16.msra.mxu3 %v980_v0  ;;  %s1077_s11 = smov 64  }
  0x12   : > { %s1078_s10 = smov 32  }
  0x13   : > { %914 = vmatmul.msk.bf16.vlgmr.msra.gmra.mxu0 %vm348_vm0, %v976_v1  ;;  %915 = vmatmul.msk.bf16.vlgmr.msra.gmra.mxu1 %vm348_vm0, %v977_v2 }
  0x14   : > { %916 = vmatmul.msk.bf16.vlgmr.msra.gmra.mxu2 %vm348_vm0, %v978_v3  ;;  %917 = vmatmul.msk.bf16.vlgmr.msra.gmra.mxu3 %vm348_vm0, %v979_v4 }
  0x90   : > { %v370_v6 = vpop.f32.mrf.mxu0  ;;  %v375_v7 = vpop.f32.mrf.mxu1 }
  0x91   : > { %v371_v8 = vadd.f32 %v1027_v5, %v370_v6  ;;  %v376_v9 = vadd.f32 %v1027_v5, %v375_v7 }
  0x93   : > { %391 = vst.msk [vmem:[#allocation2] sm:$0xff] %vm390_vm1, %v371_v8  ;;  %411 = vrot.lane.b32.xlu1 %v376_v9, %s1076_s9  ;;  %439 = vrot.lane.b32.xlu2 %v371_v8, %s1077_s11 }
  0x94   : > { %393 = vst.msk [vmem:[#allocation2 + $0x10] sm:$0xff] %vm390_vm1, %v376_v9  ;;  %407 = vrot.lane.b32.xlu0 %v371_v8, %s1076_s9 }
  0x97   : > { %v380_v10 = vpop.f32.mrf.mxu2  ;;  %v385_v11 = vpop.f32.mrf.mxu3 }
  0x98   : > { %v372_v12 = vpop.f32.mrf.mxu0  ;;  %v377_v13 = vpop.f32.mrf.mxu1  ;;  %v381_v14 = vadd.f32 %v1027_v5, %v380_v10  ;;  %v386_v17 = vadd.f32 %v1027_v5, %v385_v11 }
  0x99   : > { %v373_v15 = vadd.f32 %v1027_v5, %v372_v12  ;;  %v378_v16 = vadd.f32 %v1027_v5, %v377_v13 }
  0x9a   : > { %395 = vst.msk [vmem:[#allocation2 + $0x20] sm:$0xff] %vm390_vm1, %v381_v14 }
  0x9b   : > { %392 = vst.msk [vmem:[#allocation2 + $0x8] sm:$0xff] %vm390_vm1, %v373_v15  ;;  %443 = vrot.lane.b32.xlu1 %v376_v9, %s1077_s11  ;;  %415 = vrot.lane.b32.xlu2 %v381_v14, %s1076_s9 }
  0x9c   : > { %394 = vst.msk [vmem:[#allocation2 + $0x18] sm:$0xff] %vm390_vm1, %v378_v16  ;;  %475 = vrot.lane.b32.xlu0 %v376_v9, %s1078_s10 }
  0x9d   : > { %397 = vst.msk [vmem:[#allocation2 + $0x30] sm:$0xff] %vm390_vm1, %v386_v17 }
  0x9f   : > { %v387_v18 = vpop.f32.mrf.mxu3  ;;  %v382_v19 = vpop.f32.mrf.mxu2 }
  0xa0   : > { %v388_v20 = vadd.f32 %v1027_v5, %v387_v18  ;;  %v383_v21 = vadd.f32 %v1027_v5, %v382_v19 }
  0xa2   : > { %398 = vst.msk [vmem:[#allocation2 + $0x38] sm:$0xff] %vm390_vm1, %v388_v20 }
  0xa3   : > { %471 = vrot.lane.b32.xlu1 %v371_v8, %s1078_s10  ;;  %451 = vrot.lane.b32.xlu2 %v386_v17, %s1077_s11  ;;  %396 = vst.msk [vmem:[#allocation2 + $0x28] sm:$0xff] %vm390_vm1, %v383_v21 }
  0xa4   : > { %419 = vrot.lane.b32.xlu0 %v386_v17, %s1076_s9 }
  0xab   : > { %413 = vrot.lane.b32.xlu1 %v378_v16, %s1076_s9  ;;  %479 = vrot.lane.b32.xlu2 %v381_v14, %s1078_s10 }
  0xac   : > { %447 = vrot.lane.b32.xlu0 %v381_v14, %s1077_s11 }
  0xb3   : > { %477 = vrot.lane.b32.xlu1 %v378_v16, %s1078_s10  ;;  %445 = vrot.lane.b32.xlu2 %v378_v16, %s1077_s11 }
  0xb4   : > { %409 = vrot.lane.b32.xlu0 %v373_v15, %s1076_s9 }
  0xbb   : > { %421 = vrot.lane.b32.xlu1 %v388_v20, %s1076_s9  ;;  %473 = vrot.lane.b32.xlu2 %v373_v15, %s1078_s10 }
  0xbc   : > { %441 = vrot.lane.b32.xlu0 %v373_v15, %s1077_s11 }
  0xc3   : > { %449 = vrot.lane.b32.xlu1 %v383_v21, %s1077_s11  ;;  %417 = vrot.lane.b32.xlu2 %v383_v21, %s1076_s9 }
  0xc4   : > { %453 = vrot.lane.b32.xlu0 %v388_v20, %s1077_s11 }
  0xcb   : > { %483 = vrot.lane.b32.xlu1 %v386_v17, %s1078_s10  ;;  %485 = vrot.lane.b32.xlu2 %v388_v20, %s1078_s10 }
  0xcc   : > { %481 = vrot.lane.b32.xlu0 %v383_v21, %s1078_s10 }
  0xed   : > { %v440_v22 = vpop.permute.xlu2 %439 }
  0xee   : > { %463 = vst.msk [vmem:[#allocation4] sm:$0xff] %vm390_vm1, %v440_v22 }
  0xf5   : > { %v416_v23 = vpop.permute.xlu2 %415 }
  0xf6   : > { %435 = vst.msk [vmem:[#allocation3 + $0x20] sm:$0xff] %vm390_vm1, %v416_v23 }
  0xfd   : > { %v452_v24 = vpop.permute.xlu2 %451 }
  0xfe   : > { %469 = vst.msk [vmem:[#allocation4 + $0x30] sm:$0xff] %vm390_vm1, %v452_v24 }
 0x105   : > { %v412_v25 = vpop.permute.xlu1 %411  ;;  %v480_v26 = vpop.permute.xlu2 %479 }
 0x106   : > { %433 = vst.msk [vmem:[#allocation3 + $0x10] sm:$0xff] %vm390_vm1, %v412_v25  ;;  %v408_v27 = vpop.permute.xlu0 %407 }
 0x107   : > { %499 = vst.msk [vmem:[#allocation5 + $0x20] sm:$0xff] %vm390_vm1, %v480_v26 }
 0x108   : > { %431 = vst.msk [vmem:[#allocation3] sm:$0xff] %vm390_vm1, %v408_v27 }
 0x10d   : > { %v444_v28 = vpop.permute.xlu1 %443  ;;  %v446_v29 = vpop.permute.xlu2 %445 }
 0x10e   : > { %465 = vst.msk [vmem:[#allocation4 + $0x10] sm:$0xff] %vm390_vm1, %v444_v28  ;;  %v476_v30 = vpop.permute.xlu0 %475 }
 0x10f   : > { %466 = vst.msk [vmem:[#allocation4 + $0x18] sm:$0xff] %vm390_vm1, %v446_v29 }
 0x110   : > { %497 = vst.msk [vmem:[#allocation5 + $0x10] sm:$0xff] %vm390_vm1, %v476_v30 }
 0x115   : > { %v472_v31 = vpop.permute.xlu1 %471  ;;  %v474_v32 = vpop.permute.xlu2 %473 }
 0x116   : > { %495 = vst.msk [vmem:[#allocation5] sm:$0xff] %vm390_vm1, %v472_v31  ;;  %v420_v33 = vpop.permute.xlu0 %419 }
 0x117   : > { %496 = vst.msk [vmem:[#allocation5 + $0x8] sm:$0xff] %vm390_vm1, %v474_v32 }
 0x118   : > { %437 = vst.msk [vmem:[#allocation3 + $0x30] sm:$0xff] %vm390_vm1, %v420_v33 }
 0x11d   : > { %v414_v34 = vpop.permute.xlu1 %413  ;;  %v418_v35 = vpop.permute.xlu2 %417 }
 0x11e   : > { %434 = vst.msk [vmem:[#allocation3 + $0x18] sm:$0xff] %vm390_vm1, %v414_v34  ;;  %v448_v36 = vpop.permute.xlu0 %447 }
 0x11f   : > { %436 = vst.msk [vmem:[#allocation3 + $0x28] sm:$0xff] %vm390_vm1, %v418_v35 }
 0x120   : > { %467 = vst.msk [vmem:[#allocation4 + $0x20] sm:$0xff] %vm390_vm1, %v448_v36 }
 0x125   : > { %v478_v37 = vpop.permute.xlu1 %477  ;;  %v486_v38 = vpop.permute.xlu2 %485 }
 0x126   : > { %498 = vst.msk [vmem:[#allocation5 + $0x18] sm:$0xff] %vm390_vm1, %v478_v37  ;;  %v410_v39 = vpop.permute.xlu0 %409 }
 0x127   : > { %502 = vst.msk [vmem:[#allocation5 + $0x38] sm:$0xff] %vm390_vm1, %v486_v38 }
 0x128   : > { %432 = vst.msk [vmem:[#allocation3 + $0x8] sm:$0xff] %vm390_vm1, %v410_v39 }
 0x12d   : > { %v422_v40 = vpop.permute.xlu1 %421 }
 0x12e   : > { %438 = vst.msk [vmem:[#allocation3 + $0x38] sm:$0xff] %vm390_vm1, %v422_v40  ;;  %v442_v41 = vpop.permute.xlu0 %441 }
 0x12f   : > { %464 = vst.msk [vmem:[#allocation4 + $0x8] sm:$0xff] %vm390_vm1, %v442_v41 }
 0x135   : > { %v450_v42 = vpop.permute.xlu1 %449 }
 0x136   : > { %468 = vst.msk [vmem:[#allocation4 + $0x28] sm:$0xff] %vm390_vm1, %v450_v42  ;;  %v454_v43 = vpop.permute.xlu0 %453 }
 0x137   : > { %470 = vst.msk [vmem:[#allocation4 + $0x38] sm:$0xff] %vm390_vm1, %v454_v43 }
 0x13d   : > { %v484_v44 = vpop.permute.xlu1 %483 }
 0x13e   : > { %501 = vst.msk [vmem:[#allocation5 + $0x30] sm:$0xff] %vm390_vm1, %v484_v44  ;;  %v482_v45 = vpop.permute.xlu0 %481 }
 0x13f   : > { %500 = vst.msk [vmem:[#allocation5 + $0x28] sm:$0xff] %vm390_vm1, %v482_v45 }
 0x140 LB: >> { %v982_v48 = vld [vmem:[%s1135_s7 + $0x8] sm:$0xff]  ;;  %v984_v49 = vld [vmem:[%s1135_s7 + $0x18] sm:$0xff]  ;;  %v981_v51 = vld [vmem:[%s1135_s7] sm:$0xff]  ;;  %v515_v56 = vpack.c.bf16 %v1070_v47, %v1070_v47  ;;  %p511_p4 = scmp.eq.s32.totalorder %s1120_s22, 0  ;;  %s512_s13 = ssub.s32 7, %s1074_s12  ;;  %vm718_vm14 = vcmask 257024   ;;  %s1074_s12 = sphi %s1217_s12, %s508_s12   ;;  %v1070_v47 = vphi %v1215_v47, %v1280_v47   ;;  %v1066_v46 = vphi %v1213_v46, %v1279_v46  }
 0x141   : >> { %v988_v50 = vld [vmem:[%s1135_s7 + $0x38] sm:$0xff]  ;;  %543 = vmatpush.bf16.msra.mxu0 %v982_v48  ;;  %576 = vmatpush.bf16.msra.mxu1 %v984_v49  ;;  %v983_v52 = vld [vmem:[%s1135_s7 + $0x10] sm:$0xff]  ;;  %v986_v53 = vld [vmem:[%s1135_s7 + $0x28] sm:$0xff] }
 0x142   : >> { %642 = vmatpush.bf16.msra.mxu3 %v988_v50  ;;  %v987_v54 = vld [vmem:[%s1135_s7 + $0x30] sm:$0xff]  ;;  %609 = vmatpush.bf16.msra.mxu2 %v986_v53  ;;  %v985_v55 = vld [vmem:[%s1135_s7 + $0x20] sm:$0xff]  ;;  %s513_s15 = scalar_select %p511_p4, %s1074_s12, %s512_s13 }
 0x143   : >> { %s508_s12 = sadd.s32 1, %s1074_s12  }
 0x144   : >> { %s1241_s16 = sshll.u32 %s513_s15, 3  ;;  %p505_p5 = scmp.ge.s32.totalorder %s508_s12, 8  }
 0x145   : >> { %544 = vmatpush.bf16.msra.mxu0 %v981_v51  ;;  %577 = vmatpush.bf16.msra.mxu1 %v983_v52  ;;  %s516_s18 = scalar_lea.vmem [#allocation2], %s1241_s16  ;;  %s551_s19 = scalar_lea.vmem [#allocation3], %s1241_s16 }
 0x146   : >> { %643 = vmatpush.bf16.msra.mxu3 %v987_v54  ;;  %610 = vmatpush.bf16.msra.mxu2 %v985_v55  ;;  %v517_v57 = vld [vmem:[%s516_s18] sm:$0xff]  ;;  %s617_s20 = scalar_lea.vmem [#allocation5], %s1241_s16  ;;  %s584_s25 = scalar_lea.vmem [#allocation4], %s1241_s16 }
 0x147   : >> { %v552_v58 = vld [vmem:[%s551_s19] sm:$0xff]  ;;  %s714_s26 = sshra.s32 %s1241_s16, 3 }
 0x148   : >> { %927 = vmatmul.msk.bf16.vlgmr.msra.gmra.mxu0 %vm390_vm1, %v515_v56  ;;  %940 = vmatmul.msk.bf16.vlgmr.msra.gmra.mxu1 %vm390_vm1, %v515_v56  ;;  %v618_v1 = vld [vmem:[%s617_s20] sm:$0xff]  ;;  %s970_s23 = sshll.u32 %s714_s26, 2 }
 0x149   : >> { %966 = vmatmul.msk.bf16.vlgmr.msra.gmra.mxu3 %vm390_vm1, %v515_v56  ;;  %953 = vmatmul.msk.bf16.vlgmr.msra.gmra.mxu2 %vm390_vm1, %v515_v56  ;;  %v585_v12 = vld [vmem:[%s584_s25] sm:$0xff]  ;;  %s717_s28 = scalar_lea.vmem %s1143_s14, %s970_s23 }
 0x1c5   : >> { %v546_v59 = vpop.f32.mrf.mxu0  ;;  %v579_v60 = vpop.f32.mrf.mxu1 }
 0x1c6   : >> { %v550_v61 = vadd.f32 %v546_v59, %v517_v57  ;;  %v583_v62 = vadd.f32 %v579_v60, %v552_v58 }
 0x1c8   : >> { %v967_v63 = vmul.f32 -1.442695, %v550_v61  ;;  %v968_v0 = vmul.f32 -1.442695, %v583_v62 }
 0x1ca   : >> { %1028 = vpow2.f32 %v967_v63 }
 0x1cb   : >> { %1030 = vpow2.f32 %v968_v0 }
 0x1cc   : >> { %v645_v2 = vpop.f32.mrf.mxu3  ;;  %v612_v6 = vpop.f32.mrf.mxu2 }
 0x1cd   : >> { %v649_v3 = vadd.f32 %v645_v2, %v618_v1  ;;  %v548_v4 = vpop.f32.mrf.mxu0  ;;  %v581_v5 = vpop.f32.mrf.mxu1  ;;  %v616_v16 = vadd.f32 %v612_v6, %v585_v12 }
 0x1cf   : >> { %v969_v7 = vmul.f32 -1.442695, %v649_v3 }
 0x1d0   : >> { %v1029_v8 = vpop.eup %1028 }
 0x1d1   : >> { %v1031_v9 = vpop.eup %1030  ;;  %v653_v10 = vadd.f32 1.0, %v1029_v8  ;;  %1032 = vpow2.f32 %v969_v7 }
 0x1d2   : >> { %v672_v11 = vadd.f32 1.0, %v1031_v9 }
 0x1d3   : >> { %1034 = vrcp.f32 %v653_v10  ;;  %v665_v24 = vand.u32 2147483648, %v653_v10  ;;  %v663_v27 = vand.u32 2147483647, %v653_v10  ;;  %vm659_vm4 = vweird.f32 %v653_v10 }
 0x1d4   : >> { %1036 = vrcp.f32 %v672_v11  ;;  %v647_v13 = vpop.f32.mrf.mxu3  ;;  %v614_v14 = vpop.f32.mrf.mxu2  ;;  %v684_v25 = vand.u32 2147483648, %v672_v11  ;;  %v682_v29 = vand.u32 2147483647, %v672_v11  ;;  %vm678_vm5 = vweird.f32 %v672_v11 }
 0x1d5   : >> { %v666_v34 = vor.u32 1.1754944e-38, %v665_v24  ;;  %vm664_vm8 = vcmp.eq.f32.partialorder %v663_v27, 8.507059e+37 }
 0x1d6   : >> { %v685_v36 = vor.u32 1.1754944e-38, %v684_v25  ;;  %vm683_vm9 = vcmp.eq.f32.partialorder %v682_v29, 8.507059e+37 }
 0x1d7   : >> { %v1033_v15 = vpop.eup %1032 }
 0x1d8   : >> { %v692_v17 = vadd.f32 1.0, %v1033_v15 }
 0x1d9   : >> { %v1035_v18 = vpop.eup %1034 }
 0x1da   : >> { %v1037_v19 = vpop.eup %1036  ;;  %v655_v20 = vmul.f32 %v1035_v18, %v653_v10  ;;  %1038 = vrcp.f32 %v692_v17  ;;  %vm660_vm2 = vweird.f32 %v1035_v18  ;;  %v704_v48 = vand.u32 2147483648, %v692_v17 }
 0x1db   : >> { %v674_v21 = vmul.f32 %v1037_v19, %v672_v11  ;;  %1040 = vtanh.f32 %v616_v16  ;;  %vm679_vm3 = vweird.f32 %v1037_v19  ;;  %vm661_vm6 = vmor %vm659_vm4, %vm660_vm2  ;;  %vm698_vm11 = vweird.f32 %v692_v17 }
 0x1dc   : >> { %v656_v22 = vsub.f32 1.0, %v655_v20  ;;  %vm680_vm7 = vmor %vm678_vm5, %vm679_vm3  ;;  %v702_v49 = vand.u32 2147483647, %v692_v17  ;;  %v705_v51 = vor.u32 1.1754944e-38, %v704_v48 }
 0x1dd   : >> { %v675_v23 = vsub.f32 1.0, %v674_v21 }
 0x1de   : >> { %v657_v26 = vmul.f32 %v1035_v18, %v656_v22  ;;  %vm703_vm13 = vcmp.eq.f32.partialorder %v702_v49, 8.507059e+37 }
 0x1df   : >> { %v676_v28 = vmul.f32 %v1037_v19, %v675_v23 }
 0x1e0   : >> { %v1039_v30 = vpop.eup %1038  ;;  %v658_v31 = vadd.f32 %v1035_v18, %v657_v26 }
 0x1e1   : >> { %v1041_v32 = vpop.eup %1040  ;;  %v694_v33 = vmul.f32 %v1039_v30, %v692_v17  ;;  %v677_v35 = vadd.f32 %v1037_v19, %v676_v28  ;;  %vm699_vm10 = vweird.f32 %v1039_v30 }
 0x1e2   : >> { %v662_v37 = vsel %vm661_vm6, %v1035_v18, %v658_v31  ;;  %vm700_vm12 = vmor %vm698_vm11, %vm699_vm10 }
 0x1e3   : >> { %v695_v38 = vsub.f32 1.0, %v694_v33  ;;  %v667_v39 = vsel %vm664_vm8, %v666_v34, %v662_v37  ;;  %v681_v40 = vsel %vm680_vm7, %v1037_v19, %v677_v35 }
 0x1e4   : >> { %v686_v41 = vsel %vm683_vm9, %v685_v36, %v681_v40  ;;  %v709_v42 = vmul.f32 %v1041_v32, %v667_v39 }
 0x1e5   : >> { %v696_v43 = vmul.f32 %v1039_v30, %v695_v38  ;;  %v708_v44 = vmul.f32 %v1066_v46, %v686_v41 }
 0x1e7   : >> { %v710_v45 = vadd.f32 %v709_v42, %v708_v44   ;;  %v697_v47 = vadd.f32 %v1039_v30, %v696_v43 }
 0x1e9   : >> { %1042 = vtanh.f32 %v710_v45  ;;  %v701_v50 = vsel %vm700_vm12, %v1039_v30, %v697_v47  ;;  %721 = vst.msk [vmem:[%s306_s27] sm:$0xff] (%p505_p5), %vm390_vm1, %v710_v45 }
 0x1ea   : >> { %v706_v53 = vsel %vm703_vm13, %v705_v51, %v701_v50 }
 0x1ef   : >> { %v1043_v52 = vpop.eup %1042 }
 0x1f0   : >> { %v712_v54 = vmul.f32 %v1043_v52, %v706_v53   ;;  %507 = sbr.rel (!%p505_p5) target bundleno = 320 (0x140), region = 111 }
 0x1f2   : >> { %v713_v46 = vpack.c.bf16 %v712_v54, %v712_v54  ;;  %v1280_v47 = vmov %v712_v54  ;;  %720 = vst.msk [vmem:[%s302_s17] sm:$0xff] (%p505_p5), %vm390_vm1, %v712_v54 }
 0x1f4   : >> { %719 = vst.msk [vmem:[%s717_s28] sm:$0xf] %vm718_vm14, %v713_v46  ;;  %v1279_v46 = vmov %v710_v45 }
 0x1f5 PF: > { %s17_s21 = sadd.s32 1, %s1062_s21  }
 0x1f6   : > { %p14_p6 = scmp.ge.s32.totalorder %s17_s21, 4  }
 0x1f8   :  { %16 = sbr.rel (!%p14_p6) target bundleno = 1 (0x1), region = 122 }

// kernel: encoder_forward.4
= control target key start
LH: loop header
LB: loop body
LE: loop exit
PB: predicated region body
PF: predicated region fallthrough
CT: control target
= control target key end

     0   :  { %s1824_s0 = inlined_call_operand.vmem [shape: bf16[2,64,32], index: 0, kind: input, shape index: {}]   ;;  %s1825_s1 = inlined_call_operand.hbm [shape: bf16[2,2,32,128], index: 1, kind: input, shape index: {}]   ;;  %s1826_s2 = inlined_call_operand.vmem [shape: bf16[2,4,32,32], index: 2, kind: input, shape index: {}]   ;;  %s1827_s3 = inlined_call_operand.vmem [shape: f32[2,1,128], index: 3, kind: input, shape index: {}]   ;;  %s1828_s4 = inlined_call_operand.vmem [shape: bf16[2,64,32], index: 4, kind: output, shape index: {0}]   ;;  %s1829_s5 = inlined_call_operand.hbm [shape: f32[2,8,32], index: 5, kind: output, shape index: {1}]   ;;  %s1830_s6 = inlined_call_operand.hbm [shape: f32[2,8,32], index: 6, kind: output, shape index: {2}]  }
   0x1   :  { %1832 = sst [smem:[#allocation15_spill]] %s1824_s0 }
   0x2   :  { %12 = vsyncpa [#allocation7], 0 }
   0x3   :  { %14 = vsyncpa [#allocation7 + $0x1], 0 }
   0x4   :  { %15 = vsyncpa [#allocation8], 0 }
   0x5   :  { %17 = vsyncpa [#allocation8 + $0x1], 0 }
   0x6   :  { %18 = vsyncpa [#allocation11], 0 }
   0x7   :  { %20 = vsyncpa [#allocation11 + $0x1], 0  ;;  %s1518_s21 = smov 0   ;;  %s1520_s22 = smov 0  }
   0x8   :  { %s1522_s23 = smov 0   ;;  %s1524_s24 = smov 0  }
   0x9 LB: > { %s1539_s25 = sadd.s32 4294967295, %s1464_s24   ;;  %s1059_s26 = sadd.s32 4294967294, %s1464_s24   ;;  %s1464_s24 = sphi %s1524_s24, %s1846_s24   ;;  %s1460_s23 = sphi %s1522_s23, %s1845_s23   ;;  %s1456_s22 = sphi %s1520_s22, %s1844_s22   ;;  %s1452_s21 = sphi %s1518_s21, %s1843_s21  }
   0xa   : > { %s1543_s27 = sadd.s32 1, %s1464_s24   ;;  %s54_s28 = sadd.s32 1, %s1460_s23 }
   0xb   : > { %s51_s29 = ssub.s32 %s1464_s24, %s1543_s27  ;;  %p61_p0 = scmp.ne.s32.totalorder %s1460_s23, %s1456_s22 }
   0xc   : > { %p52_p1 = scmp.eq.s32.totalorder %s51_s29, 0  ;;  %p62_p2 = scmp.eq.s32.totalorder %s1464_s24, 0 }
   0xd   : > { %p67_p3 = scmp.ne.s32.totalorder %s1456_s22, %s1452_s21  ;;  %p1831_p4 = scmp.eq.s32.totalorder %s1539_s25, 0 }
   0xe   : > { %s1555_s30 = scalar_select %p52_p1, %s1460_s23, %s54_s28  }
   0xf   : > { %p1557_p5 = por %p62_p2, %p61_p0  ;;  %p1563_p6 = por %p1831_p4, %p67_p3 }
  0x10   : > { %p169_p7 = scmp.eq.s32.totalorder %s1539_s25, 1  ;;  %p175_p8 = scmp.eq.s32.totalorder %s1059_s26, 1 }
  0x11   : > { %p1244_p10 = scmp.lt.s32.totalorder %s1464_s24, 2  ;;  %s224_s11 = sand.u32 1, %s1460_s23  }
  0x12   : > { %p1570_p11 = por %p169_p7, %p61_p0  ;;  %p1574_p12 = por %p175_p8, %p67_p3 }
  0x13   : > { %s1200_s12 = sshll.u32 %s1464_s24, 5  ;;  %s1062_s13 = sshll.u32 %s224_s11, 5 }
  0x14   : > { %s233_s16 = scalar_lea.hbm %s1825_s1, %s1200_s12  ;;  %s228_s18 = scalar_lea.vmem [#allocation6], %s1062_s13 }
  0x15   : > { %s234_s17 = sshll.u32 %s233_s16, 4  ;;  %s236_s19 = sshll.u32 %s228_s18, 4  ;;  %s235_s17 = int_to_ptr.hbm [resolvable:$true] %s234_s17  ;;  %s237_s19 = int_to_ptr.vmem [resolvable:$true] %s236_s19 }
  0x16   : > { %p1585_p13 = pnand %p1244_p10, %p1557_p5  ;;  %p1065_p0 = scmp.ge.s32.totalorder %s1464_s24, 1 }
  0x17   : > { %p258_p1 = scmp.lt.s32.totalorder %s1464_s24, 3  ;;  %s225_s26 = scalar_lea.sflag [#allocation7], %s224_s11 }
  0x18   : > { %s1324_s28 = sshra.s32 %s235_s17, 4  ;;  %p1328_p3 = pneg %p1585_p13  ;;  %s1325_s28 = int_to_ptr.hbm [resolvable:$true] %s1324_s28 }
  0x19   : > { %s1326_s29 = scalar_lea.hbm %s1325_s28, 32  ;;  %s1331_s7 = scalar_lea.hbm %s1825_s1, 64 }
  0x1a   : > { %p1327_p2 = scmp.ne.s32.totalorder %s1325_s28, %s1326_s29  ;;  %p1332_p5 = scmp.lt.s32.totalorder %s1325_s28, %s1825_s1 }
  0x1b   : > { %p1333_p10 = scmp.lt.s32.totalorder %s1331_s7, %s1326_s29 }
  0x1c   : > { %p1329_p7 = pnand %p1328_p3, %p1327_p2 }
  0x1d   : > { %p1334_p9 = por %p1333_p10, %p1332_p5 }
  0x1e   : > { %p1330_p8 = pneg %p1329_p7 }
  0x20   : > { %p1335_p4 = pnand %p1334_p9, %p1330_p8 }
  0x22   : > { %1338 = shalt.err (!%p1335_p4)
}
  0x23   : > { %s1478_s11 = smov 64   ;;  %s1479_s16 = smov 4  }
  0x24   : > { %1236 = dma.hbm_to_vmem [thread:$0]  (!%p1585_p13), %s235_s17, 512, %s237_s19, %s225_s26, %s1478_s11, %s1478_s11, %s1479_s16  }
  0x25   : > { %p259_p2 = pnand %p1065_p0, %p258_p1 }
  0x26   : > { %s1606_s18 = sand.u32 (!%p259_p2), 1, %s1456_s22  }
  0x27   : > { %262 = sbr.rel (%p259_p2) target bundleno = 559 (0x22f), region = 36  ;;  %s1066_s28 = sshll.u32 (!%p259_p2), %s1606_s18, 5 }
  0x28   : > { %s265_s29 = scalar_lea.sflag (!%p259_p2), [#allocation7], %s1606_s18  ;;  %s268_s12 = scalar_lea.vmem (!%p259_p2), [#allocation6], %s1066_s28 }
  0x2c   : > { %1439 = dma.done.wait (%p1563_p6), %s265_s29, 512  }
  0x2d   : > { %1441 = vsyncadd (%p1563_p6), %s265_s29, 4294966784  ;;  %s1067_s17 = sshll.u32 %s1606_s18, 3  ;;  %v1214_v0 = vld [vmem:[%s268_s12 + $0x18] sm:$0xff]  ;;  %v1208_v1 = vld [vmem:[%s268_s12 + $0x8] sm:$0xff]  ;;  %p316_p4 = scmp.lt.s32.totalorder %s1539_s25, 1  ;;  %vm388_vm0 = vcmask 261120  }
  0x2e   : > { %407 = vmatpush.bf16.msra.mxu0 %v1214_v0  ;;  %1223 = vmatpush.bf16.msra.mxu2 %v1214_v0  ;;  %v1213_v2 = vld [vmem:[%s268_s12 + $0x10] sm:$0xff]  ;;  %v1207_v3 = vld [vmem:[%s268_s12] sm:$0xff]  ;;  %s1838_s0 = sld [smem:[#allocation15_spill]]  ;;  %s1481_s14 = smov 96  }
  0x2f   : > { %480 = vmatpush.bf16.msra.mxu1 %v1208_v1  ;;  %1225 = vmatpush.bf16.msra.mxu3 %v1208_v1  ;;  %s317_s13 = scalar_select %p316_p4, %s1539_s25, 1 }
  0x30   : > { %s1482_s11 = smov 32   ;;  %s1724_s28 = scalar_lea.vmem [#allocation10], %s1067_s17 }
  0x31   : > { %s1201_s16 = sshll.u32 %s317_s13, 6  ;;  %s323_s12 = scalar_lea.vmem %s1827_s3, %s317_s13 }
  0x32   : > { %408 = vmatpush.bf16.msra.mxu0 %v1213_v2  ;;  %1224 = vmatpush.bf16.msra.mxu2 %v1213_v2  ;;  %s1635_s26 = scalar_lea.vmem %s1826_s2, %s1201_s16  ;;  %s1202_s8 = sshll.u32 %s317_s13, 5  ;;  %v1307_v13 = vld [vmem:[%s323_s12] ss:$0 sm:$0xff] }
  0x33   : > { %481 = vmatpush.bf16.msra.mxu1 %v1207_v3  ;;  %1226 = vmatpush.bf16.msra.mxu3 %v1207_v3  ;;  %s1642_s15 = scalar_lea.vmem %s1828_s4, %s1202_s8  ;;  %s1480_s8 = smov 64  }
  0x34   : > { %v1209_v4 = vld [vmem:[%s1838_s0 + $0x20] sm:$0xff]  ;;  %v1211_v5 = vld [vmem:[%s1838_s0 + $0x30] sm:$0xff]  ;;  %v1210_v8 = vld [vmem:[%s1838_s0 + $0x28] sm:$0xff]  ;;  %s1720_s12 = scalar_lea.vmem [#allocation9], %s1067_s17  ;;  %s1730_s16 = smov 0  }
  0x35   : > { %v1203_v6 = vld [vmem:[%s1838_s0] sm:$0xff]  ;;  %v1205_v7 = vld [vmem:[%s1838_s0 + $0x10] sm:$0xff]  ;;  %1109 = vmatmul.msk.bf16.vlgmr.msra.gmra.mxu0 %vm388_vm0, %v1209_v4  ;;  %1111 = vmatmul.msk.bf16.vlgmr.msra.gmra.mxu2 %vm388_vm0, %v1211_v5  ;;  %v1212_v9 = vld [vmem:[%s1838_s0 + $0x38] sm:$0xff]  ;;  %v1726_v5 = vmov 0.0  }
  0x36   : > { %1137 = vmatmul.msk.bf16.vlgmr.msra.gmra.mxu1 %vm388_vm0, %v1203_v6  ;;  %1139 = vmatmul.msk.bf16.vlgmr.msra.gmra.mxu3 %vm388_vm0, %v1205_v7  ;;  %v1204_v10 = vld [vmem:[%s1838_s0 + $0x8] sm:$0xff]  ;;  %v1206_v11 = vld [vmem:[%s1838_s0 + $0x18] sm:$0xff]  ;;  %v1728_v6 = vmov 0.0  }
  0x45   : > { %1110 = vmatmul.msk.bf16.gmra.mxu0 %vm388_vm0, %v1210_v8  ;;  %1112 = vmatmul.msk.bf16.gmra.mxu2 %vm388_vm0, %v1212_v9 }
  0x46   : > { %1138 = vmatmul.msk.bf16.gmra.mxu1 %vm388_vm0, %v1204_v10  ;;  %1140 = vmatmul.msk.bf16.gmra.mxu3 %vm388_vm0, %v1206_v11 }
  0xb2   : > { %v410_v12 = vpop.f32.mrf.mxu0 }
  0xb3   : > { %v483_v14 = vpop.f32.mrf.mxu1 }
  0xb4   : > { %v484_v15 = vadd.f32 %v483_v14, %v410_v12 }
  0xb6   : > { %v507_v16 = vadd.f32 %v1307_v13, %v484_v15 }
  0xb8   : > { %515 = vst.msk [vmem:[#allocation2] sm:$0xff] %vm388_vm0, %v507_v16  ;;  %563 = vrot.lane.b32.xlu2 %v507_v16, %s1480_s8  ;;  %531 = vrot.lane.b32.xlu0 %v507_v16, %s1481_s14  ;;  %v420_v17 = vpop.f32.mrf.mxu2 }
  0xb9   : > { %v493_v18 = vpop.f32.mrf.mxu3  ;;  %595 = vrot.lane.b32.xlu1 %v507_v16, %s1482_s11 }
  0xba   : > { %v494_v19 = vadd.f32 %v493_v18, %v420_v17  ;;  %v412_v20 = vpop.f32.mrf.mxu0 }
  0xbb   : > { %v485_v21 = vpop.f32.mrf.mxu1 }
  0xbc   : > { %v511_v22 = vadd.f32 %v1307_v13, %v494_v19  ;;  %v486_v23 = vadd.f32 %v485_v21, %v412_v20 }
  0xbe   : > { %519 = vst.msk [vmem:[#allocation2 + $0x20] sm:$0xff] %vm388_vm0, %v511_v22  ;;  %v508_v24 = vadd.f32 %v1307_v13, %v486_v23 }
  0xc0   : > { %516 = vst.msk [vmem:[#allocation2 + $0x8] sm:$0xff] %vm388_vm0, %v508_v24  ;;  %539 = vrot.lane.b32.xlu2 %v511_v22, %s1481_s14  ;;  %571 = vrot.lane.b32.xlu0 %v511_v22, %s1480_s8  ;;  %v422_v25 = vpop.f32.mrf.mxu2 }
  0xc1   : > { %v495_v26 = vpop.f32.mrf.mxu3 }
  0xc2   : > { %v496_v27 = vadd.f32 %v495_v26, %v422_v25  ;;  %v415_v28 = vpop.f32.mrf.mxu0 }
  0xc3   : > { %v488_v29 = vpop.f32.mrf.mxu1 }
  0xc4   : > { %v512_v30 = vadd.f32 %v1307_v13, %v496_v27  ;;  %v489_v31 = vadd.f32 %v488_v29, %v415_v28 }
  0xc6   : > { %520 = vst.msk [vmem:[#allocation2 + $0x28] sm:$0xff] %vm388_vm0, %v512_v30  ;;  %v509_v32 = vadd.f32 %v1307_v13, %v489_v31  ;;  %573 = vrot.lane.b32.xlu1 %v512_v30, %s1480_s8 }
  0xc8   : > { %517 = vst.msk [vmem:[#allocation2 + $0x10] sm:$0xff] %vm388_vm0, %v509_v32  ;;  %603 = vrot.lane.b32.xlu2 %v511_v22, %s1482_s11  ;;  %533 = vrot.lane.b32.xlu0 %v508_v24, %s1481_s14  ;;  %v425_v33 = vpop.f32.mrf.mxu2 }
  0xc9   : > { %v498_v34 = vpop.f32.mrf.mxu3 }
  0xca   : > { %v417_v35 = vpop.f32.mrf.mxu0  ;;  %v499_v36 = vadd.f32 %v498_v34, %v425_v33 }
  0xcb   : > { %v490_v37 = vpop.f32.mrf.mxu1 }
  0xcc   : > { %v491_v38 = vadd.f32 %v490_v37, %v417_v35  ;;  %v513_v39 = vadd.f32 %v1307_v13, %v499_v36 }
  0xce   : > { %v510_v40 = vadd.f32 %v1307_v13, %v491_v38  ;;  %535 = vrot.lane.b32.xlu1 %v509_v32, %s1481_s14  ;;  %521 = vst.msk [vmem:[#allocation2 + $0x30] sm:$0xff] %vm388_vm0, %v513_v39 }
  0xd0   : > { %518 = vst.msk [vmem:[#allocation2 + $0x18] sm:$0xff] %vm388_vm0, %v510_v40  ;;  %597 = vrot.lane.b32.xlu2 %v508_v24, %s1482_s11  ;;  %565 = vrot.lane.b32.xlu0 %v508_v24, %s1480_s8  ;;  %v427_v41 = vpop.f32.mrf.mxu2 }
  0xd1   : > { %v500_v42 = vpop.f32.mrf.mxu3 }
  0xd2   : > { %v501_v43 = vadd.f32 %v500_v42, %v427_v41 }
  0xd4   : > { %v514_v44 = vadd.f32 %v1307_v13, %v501_v43 }
  0xd6   : > { %567 = vrot.lane.b32.xlu1 %v509_v32, %s1480_s8  ;;  %522 = vst.msk [vmem:[#allocation2 + $0x38] sm:$0xff] %vm388_vm0, %v514_v44 }
  0xd8   : > { %541 = vrot.lane.b32.xlu2 %v512_v30, %s1481_s14  ;;  %599 = vrot.lane.b32.xlu0 %v509_v32, %s1482_s11 }
  0xde   : > { %537 = vrot.lane.b32.xlu1 %v510_v40, %s1481_s14 }
  0xe0   : > { %575 = vrot.lane.b32.xlu2 %v513_v39, %s1480_s8  ;;  %543 = vrot.lane.b32.xlu0 %v513_v39, %s1481_s14 }
  0xe6   : > { %601 = vrot.lane.b32.xlu1 %v510_v40, %s1482_s11 }
  0xe8   : > { %569 = vrot.lane.b32.xlu2 %v510_v40, %s1480_s8  ;;  %577 = vrot.lane.b32.xlu0 %v514_v44, %s1480_s8 }
  0xee   : > { %545 = vrot.lane.b32.xlu1 %v514_v44, %s1481_s14 }
  0xf0   : > { %609 = vrot.lane.b32.xlu2 %v514_v44, %s1482_s11  ;;  %605 = vrot.lane.b32.xlu0 %v512_v30, %s1482_s11 }
  0xf6   : > { %607 = vrot.lane.b32.xlu1 %v513_v39, %s1482_s11 }
 0x112   : > { %v564_v45 = vpop.permute.xlu2 %563 }
 0x113   : > { %587 = vst.msk [vmem:[#allocation4] sm:$0xff] %vm388_vm0, %v564_v45 }
 0x11a   : > { %v540_v46 = vpop.permute.xlu2 %539 }
 0x11b   : > { %559 = vst.msk [vmem:[#allocation3 + $0x20] sm:$0xff] %vm388_vm0, %v540_v46 }
 0x122   : > { %v604_v47 = vpop.permute.xlu2 %603 }
 0x123   : > { %623 = vst.msk [vmem:[#allocation5 + $0x20] sm:$0xff] %vm388_vm0, %v604_v47 }
 0x12a   : > { %v598_v48 = vpop.permute.xlu2 %597  ;;  %v532_v49 = vpop.permute.xlu0 %531 }
 0x12b   : > { %620 = vst.msk [vmem:[#allocation5 + $0x8] sm:$0xff] %vm388_vm0, %v598_v48  ;;  %v596_v50 = vpop.permute.xlu1 %595 }
 0x12c   : > { %555 = vst.msk [vmem:[#allocation3] sm:$0xff] %vm388_vm0, %v532_v49 }
 0x12d   : > { %619 = vst.msk [vmem:[#allocation5] sm:$0xff] %vm388_vm0, %v596_v50 }
 0x132   : > { %v542_v51 = vpop.permute.xlu2 %541  ;;  %v572_v52 = vpop.permute.xlu0 %571 }
 0x133   : > { %560 = vst.msk [vmem:[#allocation3 + $0x28] sm:$0xff] %vm388_vm0, %v542_v51 }
 0x134   : > { %591 = vst.msk [vmem:[#allocation4 + $0x20] sm:$0xff] %vm388_vm0, %v572_v52 }
 0x138   : > { %v574_v53 = vpop.permute.xlu1 %573 }
 0x139   : > { %592 = vst.msk [vmem:[#allocation4 + $0x28] sm:$0xff] %vm388_vm0, %v574_v53 }
 0x13a   : > { %v576_v54 = vpop.permute.xlu2 %575  ;;  %v534_v55 = vpop.permute.xlu0 %533 }
 0x13b   : > { %593 = vst.msk [vmem:[#allocation4 + $0x30] sm:$0xff] %vm388_vm0, %v576_v54 }
 0x13c   : > { %556 = vst.msk [vmem:[#allocation3 + $0x8] sm:$0xff] %vm388_vm0, %v534_v55 }
 0x140   : > { %v536_v56 = vpop.permute.xlu1 %535 }
 0x141   : > { %557 = vst.msk [vmem:[#allocation3 + $0x10] sm:$0xff] %vm388_vm0, %v536_v56 }
 0x142   : > { %v570_v57 = vpop.permute.xlu2 %569  ;;  %v566_v58 = vpop.permute.xlu0 %565 }
 0x143   : > { %590 = vst.msk [vmem:[#allocation4 + $0x18] sm:$0xff] %vm388_vm0, %v570_v57 }
 0x144   : > { %588 = vst.msk [vmem:[#allocation4 + $0x8] sm:$0xff] %vm388_vm0, %v566_v58 }
 0x148   : > { %v568_v59 = vpop.permute.xlu1 %567 }
 0x149   : > { %589 = vst.msk [vmem:[#allocation4 + $0x10] sm:$0xff] %vm388_vm0, %v568_v59 }
 0x14a   : > { %v610_v60 = vpop.permute.xlu2 %609  ;;  %v600_v61 = vpop.permute.xlu0 %599 }
 0x14b   : > { %626 = vst.msk [vmem:[#allocation5 + $0x38] sm:$0xff] %vm388_vm0, %v610_v60 }
 0x14c   : > { %621 = vst.msk [vmem:[#allocation5 + $0x10] sm:$0xff] %vm388_vm0, %v600_v61 }
 0x150   : > { %v538_v62 = vpop.permute.xlu1 %537 }
 0x151   : > { %558 = vst.msk [vmem:[#allocation3 + $0x18] sm:$0xff] %vm388_vm0, %v538_v62 }
 0x152   : > { %v544_v63 = vpop.permute.xlu0 %543 }
 0x153   : > { %561 = vst.msk [vmem:[#allocation3 + $0x30] sm:$0xff] %vm388_vm0, %v544_v63 }
 0x158   : > { %v602_v0 = vpop.permute.xlu1 %601 }
 0x159   : > { %622 = vst.msk [vmem:[#allocation5 + $0x18] sm:$0xff] %vm388_vm0, %v602_v0 }
 0x15a   : > { %v578_v1 = vpop.permute.xlu0 %577 }
 0x15b   : > { %594 = vst.msk [vmem:[#allocation4 + $0x38] sm:$0xff] %vm388_vm0, %v578_v1 }
 0x160   : > { %v546_v2 = vpop.permute.xlu1 %545 }
 0x161   : > { %562 = vst.msk [vmem:[#allocation3 + $0x38] sm:$0xff] %vm388_vm0, %v546_v2 }
 0x162   : > { %v606_v3 = vpop.permute.xlu0 %605 }
 0x163   : > { %624 = vst.msk [vmem:[#allocation5 + $0x28] sm:$0xff] %vm388_vm0, %v606_v3 }
 0x168   : > { %v608_v4 = vpop.permute.xlu1 %607 }
 0x169   : > { %625 = vst.msk [vmem:[#allocation5 + $0x30] sm:$0xff] %vm388_vm0, %v608_v4 }
 0x16a LB: >> { %v1216_v7 = vld [vmem:[%s1635_s26 + $0x8] sm:$0xff]  ;;  %v1218_v8 = vld [vmem:[%s1635_s26 + $0x18] sm:$0xff]  ;;  %v1215_v10 = vld [vmem:[%s1635_s26] sm:$0xff]  ;;  %v639_v15 = vpack.c.bf16 %v1472_v6, %v1472_v6  ;;  %s636_s17 = ssub.s32 7, %s1476_s16  ;;  %p1839_p6 = scmp.eq.s32.totalorder %s1539_s25, 0  ;;  %vm842_vm13 = vcmask 257024   ;;  %s1476_s16 = sphi %s1730_s16, %s632_s16   ;;  %v1472_v6 = vphi %v1728_v6, %v1841_v6   ;;  %v1468_v5 = vphi %v1726_v5, %v1840_v5  }
 0x16b   : >> { %v1222_v9 = vld [vmem:[%s1635_s26 + $0x38] sm:$0xff]  ;;  %667 = vmatpush.bf16.msra.mxu0 %v1216_v7  ;;  %700 = vmatpush.bf16.msra.mxu1 %v1218_v8  ;;  %v1217_v11 = vld [vmem:[%s1635_s26 + $0x10] sm:$0xff]  ;;  %v1220_v12 = vld [vmem:[%s1635_s26 + $0x28] sm:$0xff] }
 0x16c   : >> { %766 = vmatpush.bf16.msra.mxu3 %v1222_v9  ;;  %v1221_v13 = vld [vmem:[%s1635_s26 + $0x30] sm:$0xff]  ;;  %733 = vmatpush.bf16.msra.mxu2 %v1220_v12  ;;  %v1219_v14 = vld [vmem:[%s1635_s26 + $0x20] sm:$0xff]  ;;  %s637_s29 = scalar_select %p1839_p6, %s1476_s16, %s636_s17 }
 0x16d   : >> { %s632_s16 = sadd.s32 1, %s1476_s16  }
 0x16e   : >> { %s1755_s13 = sshll.u32 %s637_s29, 3  ;;  %p629_p9 = scmp.ge.s32.totalorder %s632_s16, 8  }
 0x16f   : >> { %668 = vmatpush.bf16.msra.mxu0 %v1215_v10  ;;  %701 = vmatpush.bf16.msra.mxu1 %v1217_v11  ;;  %s640_s19 = scalar_lea.vmem [#allocation2], %s1755_s13  ;;  %s675_s20 = scalar_lea.vmem [#allocation3], %s1755_s13 }
 0x170   : >> { %767 = vmatpush.bf16.msra.mxu3 %v1221_v13  ;;  %734 = vmatpush.bf16.msra.mxu2 %v1219_v14  ;;  %v641_v16 = vld [vmem:[%s640_s19] sm:$0xff]  ;;  %s741_s7 = scalar_lea.vmem [#allocation5], %s1755_s13  ;;  %s708_s8 = scalar_lea.vmem [#allocation4], %s1755_s13 }
 0x171   : >> { %v676_v17 = vld [vmem:[%s675_s20] sm:$0xff]  ;;  %s838_s14 = sshra.s32 %s1755_s13, 3  ;;  %s1196_s29 = sshll.u32 (%p629_p9), %s1539_s25, 3 }
 0x172   : >> { %1150 = vmatmul.msk.bf16.vlgmr.msra.gmra.mxu0 %vm388_vm0, %v639_v15  ;;  %1163 = vmatmul.msk.bf16.vlgmr.msra.gmra.mxu1 %vm388_vm0, %v639_v15  ;;  %v742_v24 = vld [vmem:[%s741_s7] sm:$0xff]  ;;  %s1193_s11 = sshll.u32 %s838_s14, 2  ;;  %s870_s20 = scalar_lea.hbm (%p629_p9), %s1829_s5, %s1196_s29 }
 0x173   : >> { %1189 = vmatmul.msk.bf16.vlgmr.msra.gmra.mxu3 %vm388_vm0, %v639_v15  ;;  %1176 = vmatmul.msk.bf16.vlgmr.msra.gmra.mxu2 %vm388_vm0, %v639_v15  ;;  %v709_v35 = vld [vmem:[%s708_s8] sm:$0xff]  ;;  %s841_s17 = scalar_lea.vmem %s1642_s15, %s1193_s11  ;;  %s872_s7 = sshll.u32 (%p629_p9), %s1720_s12, 4  ;;  %s873_s7 = int_to_ptr.vmem [resolvable:$true] %s872_s7 }
 0x174   : > { %s874_s8 = sshll.u32 (%p629_p9), %s870_s20, 4  ;;  %s852_s16 = scalar_lea.sflag (%p629_p9), [#allocation8], %s1606_s18  ;;  %s875_s8 = int_to_ptr.hbm [resolvable:$true] %s874_s8 }
 0x175   : > { %s1368_s26 = sshra.s32 (%p629_p9), %s875_s8, 4  ;;  %s1374_s11 = scalar_lea.hbm (%p629_p9), %s1829_s5, 16  ;;  %s1369_s26 = int_to_ptr.hbm [resolvable:$true] %s1368_s26 }
 0x176   : > { %s1370_s15 = scalar_lea.hbm (%p629_p9), %s1369_s26, 8  ;;  %p1375_p3 = scmp.lt.s32.totalorder (%p629_p9), %s1369_s26, %s1829_s5 }
 0x177   : > { %p1371_p13 = scmp.ne.s32.totalorder (%p629_p9), %s1369_s26, %s1370_s15  ;;  %p1376_p7 = scmp.lt.s32.totalorder (%p629_p9), %s1374_s11, %s1370_s15 }
 0x179   : > { %p1372_p0 = pnand (%p629_p9), %p1371_p13, %p1570_p11  ;;  %p1377_p8 = por (%p629_p9), %p1376_p7, %p1375_p3 }
 0x17b   : > { %p1373_p1 = pneg (%p629_p9), %p1372_p0 }
 0x17d   : > { %p1378_p5 = pnand (%p629_p9), %p1377_p8, %p1373_p1 }
 0x1ef   : >> { %v670_v18 = vpop.f32.mrf.mxu0  ;;  %v703_v19 = vpop.f32.mrf.mxu1 }
 0x1f0   : >> { %v674_v20 = vadd.f32 %v670_v18, %v641_v16  ;;  %v707_v21 = vadd.f32 %v703_v19, %v676_v17 }
 0x1f2   : >> { %v1190_v22 = vmul.f32 -1.442695, %v674_v20  ;;  %v1191_v23 = vmul.f32 -1.442695, %v707_v21 }
 0x1f4   : >> { %1308 = vpow2.f32 %v1190_v22 }
 0x1f5   : >> { %1310 = vpow2.f32 %v1191_v23 }
 0x1f6   : >> { %v769_v25 = vpop.f32.mrf.mxu3  ;;  %v736_v29 = vpop.f32.mrf.mxu2 }
 0x1f7   : >> { %v773_v26 = vadd.f32 %v769_v25, %v742_v24  ;;  %v672_v27 = vpop.f32.mrf.mxu0  ;;  %v705_v28 = vpop.f32.mrf.mxu1  ;;  %v740_v39 = vadd.f32 %v736_v29, %v709_v35 }
 0x1f9   : >> { %v1192_v30 = vmul.f32 -1.442695, %v773_v26 }
 0x1fa   : >> { %v1309_v31 = vpop.eup %1308 }
 0x1fb   : >> { %v1311_v32 = vpop.eup %1310  ;;  %v777_v33 = vadd.f32 1.0, %v1309_v31  ;;  %1312 = vpow2.f32 %v1192_v30 }
 0x1fc   : >> { %v796_v34 = vadd.f32 1.0, %v1311_v32 }
 0x1fd   : >> { %1314 = vrcp.f32 %v777_v33  ;;  %v789_v47 = vand.u32 2147483648, %v777_v33  ;;  %v787_v50 = vand.u32 2147483647, %v777_v33  ;;  %vm783_vm3 = vweird.f32 %v777_v33 }
 0x1fe   : >> { %1316 = vrcp.f32 %v796_v34  ;;  %v771_v36 = vpop.f32.mrf.mxu3  ;;  %v738_v37 = vpop.f32.mrf.mxu2  ;;  %v808_v48 = vand.u32 2147483648, %v796_v34  ;;  %v806_v52 = vand.u32 2147483647, %v796_v34  ;;  %vm802_vm4 = vweird.f32 %v796_v34 }
 0x1ff   : >> { %v790_v57 = vor.u32 1.1754944e-38, %v789_v47  ;;  %vm788_vm7 = vcmp.eq.f32.partialorder %v787_v50, 8.507059e+37 }
 0x200   : >> { %v809_v59 = vor.u32 1.1754944e-38, %v808_v48  ;;  %vm807_vm8 = vcmp.eq.f32.partialorder %v806_v52, 8.507059e+37 }
 0x201   : >> { %v1313_v38 = vpop.eup %1312 }
 0x202   : >> { %v816_v40 = vadd.f32 1.0, %v1313_v38 }
 0x203   : >> { %v1315_v41 = vpop.eup %1314 }
 0x204   : >> { %v1317_v42 = vpop.eup %1316  ;;  %v779_v43 = vmul.f32 %v1315_v41, %v777_v33  ;;  %1318 = vrcp.f32 %v816_v40  ;;  %vm784_vm1 = vweird.f32 %v1315_v41  ;;  %v828_v7 = vand.u32 2147483648, %v816_v40 }
 0x205   : >> { %v798_v44 = vmul.f32 %v1317_v42, %v796_v34  ;;  %1320 = vtanh.f32 %v740_v39  ;;  %vm803_vm2 = vweird.f32 %v1317_v42  ;;  %vm785_vm5 = vmor %vm783_vm3, %vm784_vm1  ;;  %vm822_vm10 = vweird.f32 %v816_v40 }
 0x206   : >> { %v780_v45 = vsub.f32 1.0, %v779_v43  ;;  %vm804_vm6 = vmor %vm802_vm4, %vm803_vm2  ;;  %v826_v8 = vand.u32 2147483647, %v816_v40  ;;  %v829_v10 = vor.u32 1.1754944e-38, %v828_v7 }
 0x207   : >> { %v799_v46 = vsub.f32 1.0, %v798_v44 }
 0x208   : >> { %v781_v49 = vmul.f32 %v1315_v41, %v780_v45  ;;  %vm827_vm12 = vcmp.eq.f32.partialorder %v826_v8, 8.507059e+37 }
 0x209   : >> { %v800_v51 = vmul.f32 %v1317_v42, %v799_v46 }
 0x20a   : >> { %v1319_v53 = vpop.eup %1318  ;;  %v782_v54 = vadd.f32 %v1315_v41, %v781_v49 }
 0x20b   : >> { %v1321_v55 = vpop.eup %1320  ;;  %v818_v56 = vmul.f32 %v1319_v53, %v816_v40  ;;  %v801_v58 = vadd.f32 %v1317_v42, %v800_v51  ;;  %vm823_vm9 = vweird.f32 %v1319_v53 }
 0x20c   : >> { %v786_v60 = vsel %vm785_vm5, %v1315_v41, %v782_v54  ;;  %vm824_vm11 = vmor %vm822_vm10, %vm823_vm9 }
 0x20d   : >> { %v819_v61 = vsub.f32 1.0, %v818_v56  ;;  %v791_v62 = vsel %vm788_vm7, %v790_v57, %v786_v60  ;;  %v805_v63 = vsel %vm804_vm6, %v1317_v42, %v801_v58 }
 0x20e   : >> { %v810_v0 = vsel %vm807_vm8, %v809_v59, %v805_v63  ;;  %v833_v1 = vmul.f32 %v1321_v55, %v791_v62 }
 0x20f   : >> { %v820_v2 = vmul.f32 %v1319_v53, %v819_v61  ;;  %v832_v3 = vmul.f32 %v1468_v5, %v810_v0 }
 0x211   : >> { %v834_v4 = vadd.f32 %v833_v1, %v832_v3   ;;  %v821_v6 = vadd.f32 %v1319_v53, %v820_v2 }
 0x213   : >> { %1322 = vtanh.f32 %v834_v4  ;;  %v825_v9 = vsel %vm824_vm11, %v1319_v53, %v821_v6  ;;  %845 = vst.msk [vmem:[%s1724_s28] sm:$0xff] (%p629_p9), %vm388_vm0, %v834_v4 }
 0x214   : >> { %v830_v12 = vsel %vm827_vm12, %v829_v10, %v825_v9 }
 0x219   : >> { %v1323_v11 = vpop.eup %1322 }
 0x21a   : >> { %v836_v13 = vmul.f32 %v1323_v11, %v830_v12   ;;  %631 = sbr.rel (!%p629_p9) target bundleno = 362 (0x16a), region = 133 }
 0x21c   : >> { %v837_v5 = vpack.c.bf16 %v836_v13, %v836_v13  ;;  %v1841_v6 = vmov %v836_v13  ;;  %844 = vst.msk [vmem:[%s1720_s12] sm:$0xff] (%p629_p9), %vm388_vm0, %v836_v13 }
 0x21e   : >> { %843 = vst.msk [vmem:[%s841_s17] sm:$0xf] %vm842_vm13, %v837_v5  ;;  %v1840_v5 = vmov %v834_v4 }
 0x21f   : > { %1381 = shalt.err (!%p1378_p5)
}
 0x220   : > { %1229 = dma.vmem_to_hbm [thread:$0]  (%p1570_p11), %s873_s7, 128, %s875_s8, %s852_s16  }
 0x221   : > { %s884_s19 = scalar_lea.hbm %s1830_s6, %s1196_s29  ;;  %s886_s20 = sshll.u32 %s1724_s28, 4  ;;  %s887_s20 = int_to_ptr.vmem [resolvable:$true] %s886_s20 }
 0x222   : > { %s888_s14 = sshll.u32 %s884_s19, 4  ;;  %s857_s0 = scalar_lea.sflag [#allocation11], %s1606_s18  ;;  %s889_s14 = int_to_ptr.hbm [resolvable:$true] %s888_s14 }
 0x223   : > { %s1396_s26 = sshra.s32 %s889_s14, 4  ;;  %s1402_s7 = scalar_lea.hbm %s1830_s6, 16  ;;  %s1397_s26 = int_to_ptr.hbm [resolvable:$true] %s1396_s26 }
 0x224   : > { %s1398_s15 = scalar_lea.hbm %s1397_s26, 8  ;;  %p1403_p6 = scmp.lt.s32.totalorder %s1397_s26, %s1830_s6 }
 0x225   : > { %p1399_p10 = scmp.ne.s32.totalorder %s1397_s26, %s1398_s15  ;;  %p1404_p9 = scmp.lt.s32.totalorder %s1402_s7, %s1398_s15 }
 0x227   : > { %p1400_p2 = pnand %p1399_p10, %p1570_p11  ;;  %p1405_p13 = por %p1404_p9, %p1403_p6 }
 0x229   : > { %p1401_p4 = pneg %p1400_p2 }
 0x22b   : > { %p1406_p0 = pnand %p1405_p13, %p1401_p4 }
 0x22d   : > { %1409 = shalt.err (!%p1406_p0)
}
 0x22e   : > { %1230 = dma.vmem_to_hbm [thread:$0]  (%p1570_p11), %s887_s20, 128, %s889_s14, %s857_s0  }
 0x22f PF: > { %s908_s18 = sand.u32 1, %s1452_s21   ;;  %p1842_p1 = scmp.ge.s32.totalorder %s1464_s24, 2 }
 0x230   : > { %s909_s28 = scalar_lea.sflag [#allocation8], %s908_s18 }
 0x231   : > { %p1238_p3 = pnand %p1842_p1, %p1574_p12 }
 0x233   : > { %p1239_p7 = pneg %p1238_p3 }
 0x235   : > { %1443 = dma.done.wait (%p1239_p7), %s909_s28, 128  }
 0x236   : > { %1445 = vsyncadd (%p1239_p7), %s909_s28, 4294967168  ;;  %s919_s29 = scalar_lea.sflag [#allocation11], %s908_s18 }
 0x237   : > { %1447 = dma.done.wait (%p1239_p7), %s919_s29, 128  }
 0x238   : > { %1449 = vsyncadd (%p1239_p7), %s919_s29, 4294967168  ;;  %p23_p11 = scmp.ge.s32.totalorder %s1543_s27, 4   ;;  %s1843_s21 = smov %s1456_s22 }
 0x239   : > { %s1844_s22 = smov %s1460_s23  ;;  %s1845_s23 = smov %s1555_s30 }
 0x23a   : > { %s1846_s24 = smov %s1543_s27  ;;  %25 = sbr.rel (!%p23_p11) target bundleno = 9 (0x9), region = 144 }
 0x23f   :  { %925 = vsyncpa [#allocation7], 1 }
 0x240   :  { %927 = vsyncpa [#allocation7 + $0x1], 1 }
 0x241   :  { %928 = vsyncpa [#allocation8], 1 }
 0x242   :  { %930 = vsyncpa [#allocation8 + $0x1], 1 }
 0x243   :  { %931 = vsyncpa [#allocation11], 1 }
 0x244   :  { %933 = vsyncpa [#allocation11 + $0x1], 1 }

</bundles_post_ra>
